<compile_context>
chip_gen: v5e
topology: v5e:2x2
jax: 0.10.0
libtpu: 0.0.40
codegen_flags: <defaults>
</compile_context>

<pallas_src>
from functools import partial

import numpy as np
import jax
import jax.numpy as jnp
from jax.experimental import pallas as pl
from jax.experimental.pallas import tpu as pltpu


# ----------------------------------------------------------------------------
# Fused Pallas kernel: conv1x1 + ReLU + im2col + single deconv matmul + bias
# ----------------------------------------------------------------------------
def fcn32s_head_kernel(x_ref, wc_ref, bc_ref, mask_ref, e_ref, be_ref,
                       o_ref, sc_ref, col_ref, *, M, C, PAD, offsets):
    # ---- hoisted: runs once per M tile, gated on the trailing 'arbitrary'
    # ---- N axis (first N step); scratch persists across the remaining N steps
    @pl.when(pl.program_id(1) == 0)
    def _build():
        # conv1x1 + bias + ReLU -- score stays in VMEM (never lane-sparse in HBM)
        score = jnp.dot(x_ref[...], wc_ref[...],
                        preferred_element_type=jnp.float32)
        score = jnp.maximum(score + bc_ref[...], 0.0)            # (M, C) f32

        # row-padded copy so the 3x3 spatial taps become static row slices
        sc_ref[...] = jnp.zeros_like(sc_ref)
        sc_ref[PAD:PAD + M, :] = score

        # im2col slab (M, 9*C): boundary mask (exact zero padding) folded in,
        # cast to bf16 once, stored once
        taps = []
        for t, off in enumerate(offsets):                        # static unroll (9)
            taps.append(sc_ref[PAD + off:PAD + off + M, :] * mask_ref[:, t:t + 1])
        col_ref[...] = jnp.concatenate(taps, axis=1).astype(jnp.bfloat16)

    # ---- per N tile: ONE MXU pass (M, 9C) @ (9C, TN), f32 acc + bias, bf16 store
    acc = jnp.dot(col_ref[...], e_ref[...], preferred_element_type=jnp.float32)
    o_ref[...] = (acc + be_ref[...]).astype(o_ref.dtype)


def fcn32s_head(x_flat, wc, bc, masks, e_flat, be, *, M, C, N, PAD, offsets):
    """out_flat[m, c*s*s + ry*s + rx] of the FCN32s head, lane-dense (M, N) bf16."""
    K = x_flat.shape[1]
    TN = 1024 if N % 1024 == 0 else N          # lane-dense output tiles
    grid = (1, N // TN)                        # (M tiles 'parallel', N tiles 'arbitrary')

    flops = 2 * M * K * C + 2 * M * (9 * C) * N
    bytes_accessed = (M * K * 2 + K * C * 2 + C * 4 + M * 9 * 4
                      + 9 * C * N * 2 + N * 4 + M * N * 2)

    return pl.pallas_call(
        partial(fcn32s_head_kernel, M=M, C=C, PAD=PAD, offsets=offsets),
        out_shape=jax.ShapeDtypeStruct((M, N), jnp.bfloat16),
        grid=grid,
        in_specs=[
            pl.BlockSpec((M, K), lambda m, n: (m, 0)),        # x5 rows (bf16)
            pl.BlockSpec((K, C), lambda m, n: (0, 0)),        # conv1x1 weight (bf16)
            pl.BlockSpec((1, C), lambda m, n: (0, 0)),        # conv1x1 bias (f32)
            pl.BlockSpec((M, 9), lambda m, n: (m, 0)),        # 3x3 boundary masks (f32)
            pl.BlockSpec((9 * C, TN), lambda m, n: (0, n)),   # deconv taps (bf16)
            pl.BlockSpec((1, TN), lambda m, n: (0, n)),       # deconv bias (f32)
        ],
        out_specs=pl.BlockSpec((M, TN), lambda m, n: (m, n)),
        scratch_shapes=[
            pltpu.VMEM((M + 2 * PAD, C), jnp.float32),   # padded score (build only)
            pltpu.VMEM((M, 9 * C), jnp.bfloat16),        # im2col slab, reused per N tile
        ],
        compiler_params=pltpu.CompilerParams(
            dimension_semantics=("parallel", "arbitrary"),
            vmem_limit_bytes=32 * 1024 * 1024,           # fits v5e/v6e/v7x scoped budgets
        ),
        cost_estimate=pl.CostEstimate(flops=flops, transcendentals=0,
                                      bytes_accessed=bytes_accessed),
    )(x_flat, wc, bc, masks, e_flat, be)


# ----------------------------------------------------------------------------
# Exact ConvTranspose2d reformulation: 3x3 conv -> (class, ry, rx) channels
# ----------------------------------------------------------------------------
def build_deconv_effective(W, b, s, pad):
    """W: PyTorch ConvTranspose2d weight (Cin, Cout, 2s, 2s), pad < s.

    Returns E_flat (9*Cin, Cout*s*s) with row order (ty, tx, cin) and column
    order (cout, ry, rx), plus b_eff (Cout*s*s,), such that a 3x3 stride-1 conv
    on the zero-padded input followed by a pixel shuffle exactly reproduces
    ConvTranspose2d(stride=s, padding=pad).
    """
    W = np.asarray(W, np.float32)
    b = np.asarray(b, np.float32)
    Cin, Cout, K, _ = W.shape
    assert K == 2 * s and 0 <= pad < s
    E = np.zeros((3, 3, Cin, Cout, s, s), np.float32)
    for ry in range(s):
        k0y, dy = (ry + pad) % s, (ry + pad) // s
        for rx in range(s):
            k0x, dx = (rx + pad) % s, (rx + pad) // s
            for jy in range(2):
                ty = 1 + dy - jy
                for jx in range(2):
                    tx = 1 + dx - jx
                    E[ty, tx, :, :, ry, rx] = W[:, :, k0y + jy * s, k0x + jx * s]
    E_flat = E.reshape(9 * Cin, Cout * s * s)
    b_eff = np.repeat(b, s * s)
    return jnp.asarray(E_flat), jnp.asarray(b_eff)


def build_tap_masks(B, H, W):
    """Row-shift offsets and 0/1 validity masks for the 9 taps on the flattened slab."""
    offsets = tuple((ty - 1) * W + (tx - 1) for ty in range(3) for tx in range(3))
    y = np.arange(H)[:, None]
    x = np.arange(W)[None, :]
    cols = []
    for ty in range(3):
        for tx in range(3):
            valid = ((y + ty - 1 >= 0) & (y + ty - 1 < H) &
                     (x + tx - 1 >= 0) & (x + tx - 1 < W)).astype(np.float32)
            cols.append(np.tile(valid.reshape(1, H * W), (B, 1)).reshape(B * H * W, 1))
    masks = np.concatenate(cols, axis=1)                       # (B*H*W, 9)
    PAD = max(8, ((W + 1 + 7) // 8) * 8)                       # >= max |offset|, 8-aligned
    return jnp.asarray(masks, jnp.float32), offsets, PAD


# ----------------------------------------------------------------------------
# FCN32s forward (takes the backbone's x5 feature map, NCHW)
# ----------------------------------------------------------------------------
def fcn32s_forward(x5_nchw, p, s=32):
    B, Cin, H5, W5 = x5_nchw.shape
    C = p["conv_b"].shape[0]
    M = B * H5 * W5
    N = C * s * s

    # channels -> lanes, bf16 operands for the MXU
    x = jnp.transpose(x5_nchw, (0, 2, 3, 1)).reshape(M, Cin).astype(jnp.bfloat16)
    masks, offsets, PAD = build_tap_masks(B, H5, W5)

    out_flat = fcn32s_head(
        x, p["conv_w_mat"], p["conv_b"].reshape(1, C).astype(jnp.float32),
        masks, p["E_flat"], p["b_eff"].reshape(1, N).astype(jnp.float32),
        M=M, C=C, N=N, PAD=PAD, offsets=offsets)               # (M, C*s*s) bf16

    # pixel shuffle + NCHW in a single transpose (columns are (class, ry, rx)),
    # executed on bf16 to halve the transpose's HBM traffic; cast to f32 at the end
    out = out_flat.reshape(B, H5, W5, C, s, s)
    out = jnp.transpose(out, (0, 3, 1, 4, 2, 5)).reshape(B, C, H5 * s, W5 * s)
    return out.astype(jnp.float32)


# ----------------------------------------------------------------------------
# Pure-JAX reference (f32, HIGHEST) for correctness check
# ----------------------------------------------------------------------------
def reference_forward(x5, p, s=32, pad=16):
    hi = jax.lax.Precision.HIGHEST
    y = jax.lax.conv_general_dilated(
        x5, p["conv_w_oihw"], (1, 1), "VALID",
        dimension_numbers=("NCHW", "OIHW", "NCHW"), precision=hi)
    score = jnp.maximum(y + p["conv_b"][None, :, None, None], 0.0)

    W = p["deconv32_w"]
    K = W.shape[2]
    Wt = jnp.flip(W, (2, 3)).transpose(1, 0, 2, 3)
    out = jax.lax.conv_general_dilated(
        score, Wt, (1, 1), padding=[(K - 1 - pad, K - 1 - pad)] * 2,
        lhs_dilation=(s, s), dimension_numbers=("NCHW", "OIHW", "NCHW"),
        precision=hi)
    return out + p["deconv32_b"][None, :, None, None]


# ----------------------------------------------------------------------------
# Main
# ----------------------------------------------------------------------------
if __name__ == "__main__":
    B, CIN, NUM_CLASSES = 2, 512, 4
    H5 = W5 = 5               # x5 spatial for a /32 backbone on 160x160 inputs
    S, PAD_DC, K_DC = 32, 16, 64

    key = jax.random.PRNGKey(0)
    ks = jax.random.split(key, 5)

    conv_w_oihw = jax.random.normal(ks[0], (NUM_CLASSES, CIN, 1, 1), jnp.float32) * 0.05
    conv_b = jax.random.normal(ks[1], (NUM_CLASSES,), jnp.float32) * 0.05
    deconv32_w = jax.random.normal(ks[2], (NUM_CLASSES, NUM_CLASSES, K_DC, K_DC),
                                   jnp.float32) * 0.05
    deconv32_b = jax.random.normal(ks[3], (NUM_CLASSES,), jnp.float32) * 0.05

    E_flat, b_eff = build_deconv_effective(deconv32_w, deconv32_b, s=S, pad=PAD_DC)

    params = dict(
        conv_w_oihw=conv_w_oihw,
        conv_w_mat=jnp.transpose(conv_w_oihw[:, :, 0, 0], (1, 0)).astype(jnp.bfloat16),
        conv_b=conv_b,
        deconv32_w=deconv32_w, deconv32_b=deconv32_b,
        E_flat=E_flat.astype(jnp.bfloat16), b_eff=b_eff,
    )

    # deterministic backbone feature map x5 (NCHW)
    x5 = jax.random.normal(ks[4], (B, CIN, H5, W5), jnp.float32)

    out = jax.jit(fcn32s_forward)(x5, params)
    out = jax.block_until_ready(out)
    assert out.shape == (B, NUM_CLASSES, S * H5, S * W5), out.shape

    ref = jax.block_until_ready(reference_forward(x5, params))
    # bf16 MXU operands + bf16 output vs. f32-HIGHEST reference -> modest tolerance
    np.testing.assert_allclose(np.asarray(out), np.asarray(ref), rtol=2e-2, atol=2e-2)

    print("KERNEL_OK")
</pallas_src>

<mosaic_0001>
module attributes {stable_mosaic.version = 11 : i64} {
  func.func @fcn32s_head_kernel(%arg0: i32, %arg1: i32, %arg2: memref<50x512xbf16, #tpu.memory_space<vmem>>, %arg3: memref<512x4xbf16, #tpu.memory_space<vmem>>, %arg4: memref<1x4xf32, #tpu.memory_space<vmem>>, %arg5: memref<50x9xf32, #tpu.memory_space<vmem>>, %arg6: memref<36x1024xbf16, #tpu.memory_space<vmem>>, %arg7: memref<1x1024xf32, #tpu.memory_space<vmem>>, %arg8: memref<50x1024xbf16, #tpu.memory_space<vmem>>, %arg9: memref<66x4xf32, #tpu.memory_space<vmem>>, %arg10: memref<50x36xbf16, #tpu.memory_space<vmem>>) attributes {dimension_semantics = [#tpu.dimension_semantics<parallel>, #tpu.dimension_semantics<arbitrary>], iteration_bounds = array<i64: 1, 4>, scalar_prefetch = 0 : i64, scratch_operands = 2 : i64, tpu.core_type = #tpu.core_type<tc>, window_params = [{transform_indices = @transform_0, window_bounds = array<i64: 50, 512>}, {pipeline_mode = #tpu.pipeline_mode<synchronous>, transform_indices = @transform_1, window_bounds = array<i64: 512, 4>}, {pipeline_mode = #tpu.pipeline_mode<synchronous>, transform_indices = @transform_2, window_bounds = array<i64: 1, 4>}, {transform_indices = @transform_3, window_bounds = array<i64: 50, 9>}, {transform_indices = @transform_4, window_bounds = array<i64: 36, 1024>}, {transform_indices = @transform_5, window_bounds = array<i64: 1, 1024>}, {transform_indices = @transform_6, window_bounds = array<i64: 50, 1024>}]} {
    %c0_i32 = arith.constant 0 : i32
    %0 = arith.cmpi eq, %arg1, %c0_i32 : i32
    %1 = arith.extui %0 : i1 to i32
    %c0_i32_0 = arith.constant 0 : i32
    %2 = arith.cmpi ne, %1, %c0_i32_0 : i32
    scf.if %2 {
      %c0_8 = arith.constant 0 : index
      %c0_9 = arith.constant 0 : index
      %11 = vector.load %arg2[%c0_8, %c0_9] : memref<50x512xbf16, #tpu.memory_space<vmem>>, vector<50x512xbf16>
      %c0_10 = arith.constant 0 : index
      %c0_11 = arith.constant 0 : index
      %12 = vector.load %arg3[%c0_10, %c0_11] : memref<512x4xbf16, #tpu.memory_space<vmem>>, vector<512x4xbf16>
      %cst_12 = arith.constant dense<0.000000e+00> : vector<50x4xf32>
      %13 = tpu.matmul %11, %12, %cst_12 {dimension_numbers = #tpu.dot_dimension_numbers<[1], [0], [0], [1], [0, 0, 1, 1], [], []>} : vector<50x512xbf16>, vector<512x4xbf16>, vector<50x4xf32> -> vector<50x4xf32>
      %c0_13 = arith.constant 0 : index
      %c0_14 = arith.constant 0 : index
      %14 = vector.load %arg4[%c0_13, %c0_14] : memref<1x4xf32, #tpu.memory_space<vmem>>, vector<1x4xf32>
      %15 = vector.broadcast %14 : vector<1x4xf32> to vector<50x4xf32>
      %16 = arith.addf %13, %15 : vector<50x4xf32>
      %cst_15 = arith.constant 0.000000e+00 : f32
      %17 = vector.broadcast %cst_15 : f32 to vector<50x4xf32>
      %18 = arith.maximumf %16, %17 : vector<50x4xf32>
      %cst_16 = arith.constant 0.000000e+00 : f32
      %19 = vector.broadcast %cst_16 : f32 to vector<66x4xf32>
      %c0_17 = arith.constant 0 : index
      %c0_18 = arith.constant 0 : index
      %20 = vector.load %arg9[%c0_17, %c0_18] : memref<66x4xf32, #tpu.memory_space<vmem>>, vector<66x4xf32>
      tpu.vector_store %arg9[%c0_17, %c0_18], %19 {strides = array<i32>} : memref<66x4xf32, #tpu.memory_space<vmem>>, vector<66x4xf32>,
      %c8 = arith.constant 8 : index
      %c0_19 = arith.constant 0 : index
      %21 = vector.load %arg9[%c8, %c0_19] : memref<66x4xf32, #tpu.memory_space<vmem>>, vector<50x4xf32>
      tpu.vector_store %arg9[%c8, %c0_19], %18 {strides = array<i32>} : memref<66x4xf32, #tpu.memory_space<vmem>>, vector<50x4xf32>,
      %c2 = arith.constant 2 : index
      %c0_20 = arith.constant 0 : index
      %22 = vector.load %arg9[%c2, %c0_20] : memref<66x4xf32, #tpu.memory_space<vmem>>, vector<50x4xf32>
      %c0_21 = arith.constant 0 : index
      %c0_22 = arith.constant 0 : index
      %23 = vector.load %arg5[%c0_21, %c0_22] : memref<50x9xf32, #tpu.memory_space<vmem>>, vector<50x1xf32>
      %24 = vector.broadcast %23 : vector<50x1xf32> to vector<50x4xf32>
      %25 = arith.mulf %22, %24 : vector<50x4xf32>
      %c3 = arith.constant 3 : index
      %c0_23 = arith.constant 0 : index
      %26 = vector.load %arg9[%c3, %c0_23] : memref<66x4xf32, #tpu.memory_space<vmem>>, vector<50x4xf32>
      %c0_24 = arith.constant 0 : index
      %c1 = arith.constant 1 : index
      %27 = vector.load %arg5[%c0_24, %c1] : memref<50x9xf32, #tpu.memory_space<vmem>>, vector<50x1xf32>
      %28 = vector.broadcast %27 : vector<50x1xf32> to vector<50x4xf32>
      %29 = arith.mulf %26, %28 : vector<50x4xf32>
      %c4 = arith.constant 4 : index
      %c0_25 = arith.constant 0 : index
      %30 = vector.load %arg9[%c4, %c0_25] : memref<66x4xf32, #tpu.memory_space<vmem>>, vector<50x4xf32>
      %c0_26 = arith.constant 0 : index
      %c2_27 = arith.constant 2 : index
      %31 = vector.load %arg5[%c0_26, %c2_27] : memref<50x9xf32, #tpu.memory_space<vmem>>, vector<50x1xf32>
      %32 = vector.broadcast %31 : vector<50x1xf32> to vector<50x4xf32>
      %33 = arith.mulf %30, %32 : vector<50x4xf32>
      %c7 = arith.constant 7 : index
      %c0_28 = arith.constant 0 : index
      %34 = vector.load %arg9[%c7, %c0_28] : memref<66x4xf32, #tpu.memory_space<vmem>>, vector<50x4xf32>
      %c0_29 = arith.constant 0 : index
      %c3_30 = arith.constant 3 : index
      %35 = vector.load %arg5[%c0_29, %c3_30] : memref<50x9xf32, #tpu.memory_space<vmem>>, vector<50x1xf32>
      %36 = vector.broadcast %35 : vector<50x1xf32> to vector<50x4xf32>
      %37 = arith.mulf %34, %36 : vector<50x4xf32>
      %c8_31 = arith.constant 8 : index
      %c0_32 = arith.constant 0 : index
      %38 = vector.load %arg9[%c8_31, %c0_32] : memref<66x4xf32, #tpu.memory_space<vmem>>, vector<50x4xf32>
      %c0_33 = arith.constant 0 : index
      %c4_34 = arith.constant 4 : index
      %39 = vector.load %arg5[%c0_33, %c4_34] : memref<50x9xf32, #tpu.memory_space<vmem>>, vector<50x1xf32>
      %40 = vector.broadcast %39 : vector<50x1xf32> to vector<50x4xf32>
      %41 = arith.mulf %38, %40 : vector<50x4xf32>
      %c9 = arith.constant 9 : index
      %c0_35 = arith.constant 0 : index
      %42 = vector.load %arg9[%c9, %c0_35] : memref<66x4xf32, #tpu.memory_space<vmem>>, vector<50x4xf32>
      %c0_36 = arith.constant 0 : index
      %c5 = arith.constant 5 : index
      %43 = vector.load %arg5[%c0_36, %c5] : memref<50x9xf32, #tpu.memory_space<vmem>>, vector<50x1xf32>
      %44 = vector.broadcast %43 : vector<50x1xf32> to vector<50x4xf32>
      %45 = arith.mulf %42, %44 : vector<50x4xf32>
      %c12 = arith.constant 12 : index
      %c0_37 = arith.constant 0 : index
      %46 = vector.load %arg9[%c12, %c0_37] : memref<66x4xf32, #tpu.memory_space<vmem>>, vector<50x4xf32>
      %c0_38 = arith.constant 0 : index
      %c6 = arith.constant 6 : index
      %47 = vector.load %arg5[%c0_38, %c6] : memref<50x9xf32, #tpu.memory_space<vmem>>, vector<50x1xf32>
      %48 = vector.broadcast %47 : vector<50x1xf32> to vector<50x4xf32>
      %49 = arith.mulf %46, %48 : vector<50x4xf32>
      %c13 = arith.constant 13 : index
      %c0_39 = arith.constant 0 : index
      %50 = vector.load %arg9[%c13, %c0_39] : memref<66x4xf32, #tpu.memory_space<vmem>>, vector<50x4xf32>
      %c0_40 = arith.constant 0 : index
      %c7_41 = arith.constant 7 : index
      %51 = vector.load %arg5[%c0_40, %c7_41] : memref<50x9xf32, #tpu.memory_space<vmem>>, vector<50x1xf32>
      %52 = vector.broadcast %51 : vector<50x1xf32> to vector<50x4xf32>
      %53 = arith.mulf %50, %52 : vector<50x4xf32>
      %c14 = arith.constant 14 : index
      %c0_42 = arith.constant 0 : index
      %54 = vector.load %arg9[%c14, %c0_42] : memref<66x4xf32, #tpu.memory_space<vmem>>, vector<50x4xf32>
      %c0_43 = arith.constant 0 : index
      %c8_44 = arith.constant 8 : index
      %55 = vector.load %arg5[%c0_43, %c8_44] : memref<50x9xf32, #tpu.memory_space<vmem>>, vector<50x1xf32>
      %56 = vector.broadcast %55 : vector<50x1xf32> to vector<50x4xf32>
      %57 = arith.mulf %54, %56 : vector<50x4xf32>
      %58 = tpu.concatenate %25, %29, %33, %37, %41, %45, %49, %53, %57 in 1 : vector<50x4xf32>, vector<50x4xf32>, vector<50x4xf32>, vector<50x4xf32>, vector<50x4xf32>, vector<50x4xf32>, vector<50x4xf32>, vector<50x4xf32>, vector<50x4xf32> -> vector<50x36xf32>
      %59 = arith.truncf %58 : vector<50x36xf32> to vector<50x36xbf16>
      %c0_45 = arith.constant 0 : index
      %c0_46 = arith.constant 0 : index
      %60 = vector.load %arg10[%c0_45, %c0_46] : memref<50x36xbf16, #tpu.memory_space<vmem>>, vector<50x36xbf16>
      tpu.vector_store %arg10[%c0_45, %c0_46], %59 {strides = array<i32>} : memref<50x36xbf16, #tpu.memory_space<vmem>>, vector<50x36xbf16>,
    } else {
    }
    %c0 = arith.constant 0 : index
    %c0_1 = arith.constant 0 : index
    %3 = vector.load %arg10[%c0, %c0_1] : memref<50x36xbf16, #tpu.memory_space<vmem>>, vector<50x36xbf16>
    %c0_2 = arith.constant 0 : index
    %c0_3 = arith.constant 0 : index
    %4 = vector.load %arg6[%c0_2, %c0_3] : memref<36x1024xbf16, #tpu.memory_space<vmem>>, vector<36x1024xbf16>
    %cst = arith.constant dense<0.000000e+00> : vector<50x1024xf32>
    %5 = tpu.matmul %3, %4, %cst {dimension_numbers = #tpu.dot_dimension_numbers<[1], [0], [0], [1], [0, 0, 1, 1], [], []>} : vector<50x36xbf16>, vector<36x1024xbf16>, vector<50x1024xf32> -> vector<50x1024xf32>
    %c0_4 = arith.constant 0 : index
    %c0_5 = arith.constant 0 : index
    %6 = vector.load %arg7[%c0_4, %c0_5] : memref<1x1024xf32, #tpu.memory_space<vmem>>, vector<1x1024xf32>
    %7 = vector.broadcast %6 : vector<1x1024xf32> to vector<50x1024xf32>
    %8 = arith.addf %5, %7 : vector<50x1024xf32>
    %9 = arith.truncf %8 : vector<50x1024xf32> to vector<50x1024xbf16>
    %c0_6 = arith.constant 0 : index
    %c0_7 = arith.constant 0 : index
    %10 = vector.load %arg8[%c0_6, %c0_7] : memref<50x1024xbf16, #tpu.memory_space<vmem>>, vector<50x1024xbf16>
    tpu.vector_store %arg8[%c0_6, %c0_7], %9 {strides = array<i32>} : memref<50x1024xbf16, #tpu.memory_space<vmem>>, vector<50x1024xbf16>,
    return
  }
  func.func @transform_0(%arg0: i32, %arg1: i32) -> (i32, i32) {
    %c0_i32 = arith.constant 0 : i32
    %c0_i32_0 = arith.constant 0 : i32
    return %arg0, %c0_i32 : i32, i32
  }
  func.func @transform_1(%arg0: i32, %arg1: i32) -> (i32, i32) {
    %c0_i32 = arith.constant 0 : i32
    %c0_i32_0 = arith.constant 0 : i32
    %c0_i32_1 = arith.constant 0 : i32
    return %c0_i32, %c0_i32_0 : i32, i32
  }
  func.func @transform_2(%arg0: i32, %arg1: i32) -> (i32, i32) {
    %c0_i32 = arith.constant 0 : i32
    %c0_i32_0 = arith.constant 0 : i32
    %c0_i32_1 = arith.constant 0 : i32
    return %c0_i32, %c0_i32_0 : i32, i32
  }
  func.func @transform_3(%arg0: i32, %arg1: i32) -> (i32, i32) {
    %c0_i32 = arith.constant 0 : i32
    %c0_i32_0 = arith.constant 0 : i32
    return %arg0, %c0_i32 : i32, i32
  }
  func.func @transform_4(%arg0: i32, %arg1: i32) -> (i32, i32) {
    %c0_i32 = arith.constant 0 : i32
    %c0_i32_0 = arith.constant 0 : i32
    return %c0_i32, %arg1 : i32, i32
  }
  func.func @transform_5(%arg0: i32, %arg1: i32) -> (i32, i32) {
    %c0_i32 = arith.constant 0 : i32
    %c0_i32_0 = arith.constant 0 : i32
    return %c0_i32, %arg1 : i32, i32
  }
  func.func @transform_6(%arg0: i32, %arg1: i32) -> (i32, i32) {
    %c0_i32 = arith.constant 0 : i32
    return %arg0, %arg1 : i32, i32
  }
}

</mosaic_0001>

<bundles_post_ra>
// kernel: fcn32s_forward.1
= control target key start
LH: loop header
LB: loop body
LE: loop exit
PB: predicated region body
PF: predicated region fallthrough
CT: control target
= control target key end

     0   :  { %s4053_s0 = inlined_call_operand.vmem [shape: bf16[50,512], index: 0, kind: input, shape index: {}]   ;;  %s4054_s1 = inlined_call_operand.vmem [shape: bf16[512,4], index: 1, kind: input, shape index: {}]   ;;  %s4055_s2 = inlined_call_operand.hbm [shape: f32[1,4], index: 2, kind: input, shape index: {}]   ;;  %s4056_s3 = inlined_call_operand.hbm [shape: f32[50,9], index: 3, kind: input, shape index: {}]   ;;  %s4057_s4 = inlined_call_operand.hbm [shape: bf16[36,4096], index: 4, kind: input, shape index: {}]   ;;  %s4058_s5 = inlined_call_operand.hbm [shape: f32[1,4096], index: 5, kind: input, shape index: {}]   ;;  %s4059_s6 = inlined_call_operand.vmem [shape: bf16[50,4096], index: 6, kind: output, shape index: {}]  }
   0x1   :  { %4064 = sst [smem:[#allocation19_spill]] %s4055_s2 }
   0x2   :  { %4065 = sst [smem:[#allocation20_spill]] %s4057_s4 }
   0x3   :  { %4066 = sst [smem:[#allocation21_spill]] %s4059_s6 }
   0x4   :  { %11 = vsyncpa [#allocation5], 0 }
   0x5   :  { %12 = vsyncpa [#allocation7], 0  ;;  %s3128_s21 = smov 0   ;;  %s3130_s22 = smov 0  }
   0x6   :  { %s3132_s23 = smov 0   ;;  %s3134_s24 = smov 0  }
   0x7   :  { %s3136_s25 = smov 0   ;;  %s3138_s26 = smov 0  }
   0x8 LB: > { %4067 = sst [smem:[#allocation14_spill]] %s3054_s23  ;;  %s3157_s27 = sadd.s32 4294967295, %s3066_s26   ;;  %s3066_s26 = sphi %s3138_s26, %s18_s26   ;;  %s3062_s25 = sphi %s3136_s25, %s4089_s25   ;;  %s3058_s24 = sphi %s3134_s24, %s4088_s24   ;;  %s3054_s23 = sphi %s3132_s23, %s4084_s23   ;;  %s3050_s22 = sphi %s3130_s22, %s4087_s22   ;;  %s3046_s21 = sphi %s3128_s21, %s4086_s21  }
   0x9   : > { %4068 = sst [smem:[#allocation15_spill]] %s3066_s26  ;;  %s27_s28 = sadd.s32 1, %s3062_s25 }
   0xa   : > { %p28_p0 = scmp.ge.s32.totalorder %s27_s28, 4  ;;  %s131_s29 = sadd.s32 1, %s3054_s23 }
   0xb   : > { %p138_p1 = scmp.ne.s32.totalorder %s3054_s23, %s3050_s22  ;;  %p139_p2 = scmp.eq.s32.totalorder %s3066_s26, 0 }
   0xc   : > { %s4091_s28 = smov (%p28_p0, %s27_s28), 0  ;;  %p144_p4 = scmp.ne.s32.totalorder %s3050_s22, %s3046_s21 }
   0xd   : > { %4069 = sst [smem:[#allocation16_spill]] %s4091_s28  ;;  %p3166_p3 = por %p139_p2, %p138_p1 }
   0xe   : > { %s128_s7 = ssub.s32 %s3062_s25, %s4091_s28  ;;  %p145_p5 = scmp.eq.s32.totalorder %s3157_s27, 0 }
   0xf   : > { %p129_p6 = scmp.eq.s32.totalorder %s128_s7, 0  ;;  %p196_p7 = scmp.eq.s32.totalorder %s3157_s27, 3 }
  0x10   : > { %p3177_p8 = por %p145_p5, %p144_p4  ;;  %p2266_p9 = scmp.ge.s32.totalorder %s3066_s26, 1 }
  0x11   : > { %s3183_s9 = scalar_select %p129_p6, %s3054_s23, %s131_s29  }
  0x12   : > { %p3185_p10 = por %p196_p7, %p138_p1  ;;  %p209_p11 = scmp.lt.s32.totalorder %s3066_s26, 5 }
  0x13   : > { %4072 = sst [smem:[#allocation17_spill]] %s3183_s9  ;;  %s3068_s15 = smov [#allocation4]  }
  0x14   : > { %s4073_s10 = scalar_select %p3185_p10, 1, 0 }
  0x15   : > { %s4075_s2 = sld [smem:[#allocation19_spill]]  ;;  %p3193_p12 = pnand %p2266_p9, %p209_p11 }
  0x16   : > { %4074 = sst [smem:[#allocation18_spill]] %s4073_s10  ;;  %s236_s16 = sshll.u32 %s3068_s15, 4  ;;  %s237_s16 = int_to_ptr.vmem [resolvable:$true] %s236_s16 }
  0x17   : > { %p2648_p13 = pneg %p3193_p12  ;;  %p2664_p0 = scmp.lt.s32.totalorder %s3066_s26, 4 }
  0x18   : > { %s264_s18 = sand.u32 1, %s3066_s26   ;;  %s266_s20 = sand.u32 1, %s3054_s23  }
  0x19   : > { %p3202_p1 = pnand %p2648_p13, %p145_p5  ;;  %p3209_p2 = pnand %p2664_p0, %p3166_p3 }
  0x1a   : > { %s2633_s21 = smul.u32 160, %s266_s20  ;;  %s2568_s29 = sshll.u32 %s3062_s25, 5 }
  0x1b   : > { %s234_s13 = sshll.u32 %s4075_s2, 4  ;;  %s4079_s4 = sld [smem:[#allocation20_spill]]  ;;  %s235_s13 = int_to_ptr.hbm [resolvable:$true] %s234_s13 }
  0x1c   : > { %2651 = dma.hbm_to_vmem [thread:$0]  (!%p3202_p1), %s235_s13, 16, %s237_s16, [#allocation5]  }
  0x1d   : > { %s268_s2 = scalar_lea.vmem [#allocation8], %s2633_s21  ;;  %s265_s30 = scalar_lea.sflag [#allocation5], %s264_s18 }
  0x1e   : > { %s276_s28 = sshll.u32 %s268_s2, 4  ;;  %s3069_s9 = smov 2048   ;;  %s277_s28 = int_to_ptr.vmem [resolvable:$true] %s276_s28 }
  0x1f   : > { %s3070_s26 = smov 512   ;;  %s3071_s6 = smov 32  }
  0x20   : > { %s248_s23 = sshll.u32 %s4056_s3, 4  ;;  %s2273_s2 = sshll.u32 %s266_s20, 3  ;;  %s249_s23 = int_to_ptr.hbm [resolvable:$true] %s248_s23 }
  0x21   : > { %s273_s12 = scalar_lea.hbm %s4079_s4, %s2568_s29  ;;  %s3072_s29 = smov [#allocation6]  }
  0x22   : > { %s274_s15 = sshll.u32 %s273_s12, 4  ;;  %s250_s7 = sshll.u32 %s3072_s29, 4  ;;  %s275_s15 = int_to_ptr.hbm [resolvable:$true] %s274_s15  ;;  %s251_s7 = int_to_ptr.vmem [resolvable:$true] %s250_s7 }
  0x23   : > { %2658 = dma.hbm_to_vmem [thread:$0]  (!%p3209_p2), %s275_s15, 2560, %s277_s28, %s265_s30, %s3069_s9, %s3070_s26, %s3071_s6  }
  0x24   : > { %s3073_s21 = smov 128   ;;  %s3074_s11 = smov 8  }
  0x25   : > { %2654 = dma.hbm_to_vmem [thread:$0]  (!%p3202_p1), %s249_s23, 896, %s251_s7, [#allocation7], %s3073_s21, %s3073_s21, %s3074_s11  }
  0x26   : > { %s2274_s18 = sshll.u32 %s3062_s25, 3  ;;  %s290_s6 = scalar_lea.vmem [#allocation9], %s2273_s2 }
  0x27   : > { %s294_s10 = scalar_lea.hbm %s4058_s5, %s2274_s18  ;;  %s298_s26 = sshll.u32 %s290_s6, 4  ;;  %s299_s26 = int_to_ptr.vmem [resolvable:$true] %s298_s26 }
  0x28   : > { %s296_s28 = sshll.u32 %s294_s10, 4  ;;  %307 = sbr.rel (%p3193_p12) target bundleno = 769 (0x301), region = 44  ;;  %s297_s28 = int_to_ptr.hbm [resolvable:$true] %s296_s28 }
  0x29   : > { %2661 = dma.hbm_to_vmem [thread:$0]  (!%p3209_p2), %s297_s28, 128, %s299_s26, %s265_s30  }
  0x2d   : > { %3033 = dma.done.wait (%p145_p5), [#allocation5], 16  }
  0x2e   : > { %3035 = vsyncadd (%p145_p5), [#allocation5], 4294967280 }
  0x2f   : > { %3037 = dma.done.wait (%p145_p5), [#allocation7], 896  }
  0x30   : > { %3039 = vsyncadd (%p145_p5), [#allocation7], 4294966400  ;;  %s319_s4 = sand.u32 1, %s3157_s27   ;;  %s321_s23 = sand.u32 1, %s3050_s22  }
  0x31   : > { %s2634_s9 = smul.u32 160, %s321_s23  ;;  %s320_s10 = scalar_lea.sflag [#allocation5], %s319_s4 }
  0x33   : > { %s3245_s14 = scalar_lea.vmem [#allocation8], %s2634_s9 }
  0x34   : > { %3041 = dma.done.wait (%p3177_p8), %s320_s10, 2688  }
  0x35   : > { %3043 = vsyncadd (%p3177_p8), %s320_s10, 4294964608  ;;  %s2278_s17 = sshll.u32 %s321_s23, 3  ;;  %s2635_s19 = smul.u32 224, %s321_s23 }
  0x36   : > { %s3251_s20 = scalar_lea.vmem [#allocation9], %s2278_s17  ;;  %p2279_p3 = scmp.ne.s32.totalorder %s3058_s24, 0 }
  0x37   : > { %s3253_s15 = scalar_lea.vmem [#allocation10], %s2635_s19  ;;  %s3085_s12 = smov (!%p2279_p3), 8  }
  0x38   : > { %389 = sbr.rel (%p2279_p3) target bundleno = 494 (0x1ee), region = 64  ;;  %s3086_s6 = smov (!%p2279_p3), 4  }
  0x39   : > { %s3087_s26 = smov (!%p2279_p3), 12   ;;  %s3088_s28 = smov (!%p2279_p3), 16  }
  0x3a   : > { %s3089_s4 = smov (!%p2279_p3), 20   ;;  %s3090_s23 = smov (!%p2279_p3), 24  }
  0x3b   : > { %s3091_s9 = smov (!%p2279_p3), 28   ;;  %s3092_s10 = smov (!%p2279_p3), 32  }
  0x3d   : > { %v3256_v0 = vld [vmem:[#allocation6 + $0x20] sm:$0xff]  ;;  %v3258_v1 = vld [vmem:[#allocation6 + $0x10] sm:$0xff]  ;;  %v3075_v3 = vmov 0   ;;  %v3289_v12 = vld [vmem:[#allocation6 + $0x28] sm:$0xff]  ;;  %v3076_v26 = vmov 1   ;;  %v3077_v53 = vmov 2  }
  0x3e   : > { %v3260_v2 = vld [vmem:[#allocation6] sm:$0xff]  ;;  %2742 = vset.pattern.permute.xlu2 %v3075_v3  ;;  %2741 = vset.pattern.permute.xlu1 %v3075_v3  ;;  %v2604_v4 = vld [vmem:[%s4054_s1 + $0xb8] sm:$0xff]  ;;  %v2603_v8 = vld [vmem:[%s4054_s1 + $0xb0] sm:$0xff]  ;;  %vm857_vm0 = vcmask 31744   ;;  %vm866_vm1 = vcmask 25600   ;;  %vm1498_vm2 = vcmask 64512  }
  0x3f   : > { %v2588_v5 = vld [vmem:[%s4054_s1 + $0x38] sm:$0xff]  ;;  %2740 = vset.pattern.permute.xlu0 %v3075_v3  ;;  %911 = vperm.xlu2 %2742, %v3256_v0   ;;  %v2587_v9 = vld [vmem:[%s4054_s1 + $0x30] sm:$0xff]  ;;  %v2602_v15 = vld [vmem:[%s4054_s1 + $0xa8] sm:$0xff]  ;;  %vm1506_vm3 = vcmask 97280   ;;  %vm1514_vm4 = vcmask 130048   ;;  %vm1522_vm5 = vcmask 162816  }
  0x40   : > { %v2612_v6 = vld [vmem:[%s4054_s1 + $0xf8] sm:$0xff]  ;;  %901 = vperm.xlu1 %2741, %v3258_v1   ;;  %891 = vperm.xlu0 %2740, %v3260_v2   ;;  %v2611_v10 = vld [vmem:[%s4054_s1 + $0xf0] sm:$0xff]  ;;  %v2586_v16 = vld [vmem:[%s4054_s1 + $0x28] sm:$0xff]  ;;  %vm1530_vm6 = vcmask 195584   ;;  %vm1538_vm7 = vcmask 228352   ;;  %vm1546_vm8 = vcmask 261120  }
  0x41   : > { %v2596_v7 = vld [vmem:[%s4054_s1 + $0x78] sm:$0xff]  ;;  %794 = vmatpush.bf16.msra.mxu2 %v2604_v4  ;;  %738 = vmatpush.bf16.msra.mxu0 %v2588_v5  ;;  %v2595_v11 = vld [vmem:[%s4054_s1 + $0x70] sm:$0xff]  ;;  %v2610_v17 = vld [vmem:[%s4054_s1 + $0xe8] sm:$0xff]  ;;  %v3078_v5 = vmov 3   ;;  %vm1561_vm9 = vcmask 289792   ;;  %vm1568_vm10 = vcmask 286720  }
  0x42   : > { %822 = vmatpush.bf16.msra.mxu3 %v2612_v6  ;;  %766 = vmatpush.bf16.msra.mxu1 %v2596_v7  ;;  %v3291_v13 = vld [vmem:[#allocation6 + $0x18] sm:$0xff]  ;;  %v3293_v14 = vld [vmem:[#allocation6 + $0x8] sm:$0xff]  ;;  %v3322_v23 = vld [vmem:[#allocation6 + $0x30] sm:$0x3] }
  0x43   : > { %v2594_v18 = vld [vmem:[%s4054_s1 + $0x68] sm:$0xff]  ;;  %v2601_v19 = vld [vmem:[%s4054_s1 + $0xa0] sm:$0xff]  ;;  %v2600_v24 = vld [vmem:[%s4054_s1 + $0x98] sm:$0xff] }
  0x44   : > { %v2585_v20 = vld [vmem:[%s4054_s1 + $0x20] sm:$0xff]  ;;  %v2584_v25 = vld [vmem:[%s4054_s1 + $0x18] sm:$0xff]  ;;  %v2599_v29 = vld [vmem:[%s4054_s1 + $0x90] sm:$0xff] }
  0x45   : > { %795 = vmatpush.bf16.msra.mxu2 %v2603_v8  ;;  %739 = vmatpush.bf16.msra.mxu0 %v2587_v9  ;;  %v2609_v21 = vld [vmem:[%s4054_s1 + $0xe0] sm:$0xff]  ;;  %v2608_v27 = vld [vmem:[%s4054_s1 + $0xd8] sm:$0xff]  ;;  %v2583_v30 = vld [vmem:[%s4054_s1 + $0x10] sm:$0xff] }
  0x46   : > { %823 = vmatpush.bf16.msra.mxu3 %v2611_v10  ;;  %767 = vmatpush.bf16.msra.mxu1 %v2595_v11  ;;  %v2593_v22 = vld [vmem:[%s4054_s1 + $0x60] sm:$0xff]  ;;  %v2592_v28 = vld [vmem:[%s4054_s1 + $0x58] sm:$0xff]  ;;  %v2607_v31 = vld [vmem:[%s4054_s1 + $0xd0] sm:$0xff] }
  0x47   : > { %916 = vperm.xlu2 %2742, %v3289_v12   ;;  %v2591_v32 = vld [vmem:[%s4054_s1 + $0x50] sm:$0xff]  ;;  %v2598_v33 = vld [vmem:[%s4054_s1 + $0x88] sm:$0xff]  ;;  %v2597_v37 = vld [vmem:[%s4054_s1 + $0x80] sm:$0xff] }
  0x48   : > { %906 = vperm.xlu1 %2741, %v3291_v13   ;;  %896 = vperm.xlu0 %2740, %v3293_v14   ;;  %v2582_v34 = vld [vmem:[%s4054_s1 + $0x8] sm:$0xff]  ;;  %v2572_v39 = vld [vmem:[%s4053_s0 + $0x14] sm:$0xf0]  ;;  %v2581_v40 = vld [vmem:[%s4054_s1] sm:$0xff] }
  0x49   : > { %796 = vmatpush.bf16.msra.mxu2 %v2602_v15  ;;  %740 = vmatpush.bf16.msra.mxu0 %v2586_v16  ;;  %v2606_v35 = vld [vmem:[%s4054_s1 + $0xc8] sm:$0xff]  ;;  %v2605_v41 = vld [vmem:[%s4054_s1 + $0xc0] sm:$0xff]  ;;  %v2571_v44 = vld [vmem:[%s4053_s0 + $0xc] sm:$0xf0] }
  0x4a   : > { %824 = vmatpush.bf16.msra.mxu3 %v2610_v17  ;;  %768 = vmatpush.bf16.msra.mxu1 %v2594_v18  ;;  %v2590_v36 = vld [vmem:[%s4054_s1 + $0x48] sm:$0xff]  ;;  %v2589_v42 = vld [vmem:[%s4054_s1 + $0x40] sm:$0xff]  ;;  %v2292_v47 = vld [vmem:[%s4053_s0 + $0x18] sm:$0xf0] }
  0x4b   : > { %v2290_v38 = vld [vmem:[%s4053_s0 + $0x8] sm:$0xf]  ;;  %v2282_v43 = vld [vmem:[%s4053_s0] sm:$0xf]  ;;  %v2570_v45 = vld [vmem:[%s4053_s0 + $0xc] sm:$0xf] }
  0x4c   : > { %v2291_v46 = vor.u32 %v2572_v39, %v2290_v38  ;;  %v2569_v48 = vld [vmem:[%s4053_s0 + $0x4] sm:$0xf]  ;;  %v2284_v49 = vld [vmem:[%s4053_s0 + $0x10] sm:$0xf0]  ;;  %v2283_v50 = vor.u32 %v2571_v44, %v2282_v43  ;;  %v2295_v51 = vor.u32 %v2570_v45, %v2292_v47  ;;  %v2306_v54 = vld [vmem:[%s4053_s0 + $0x28] sm:$0xf] }
  0x4d   : > { %797 = vmatpush.bf16.msra.mxu2 %v2601_v19  ;;  %741 = vmatpush.bf16.msra.mxu0 %v2585_v20  ;;  %v2287_v52 = vor.u32 %v2569_v48, %v2284_v49  ;;  %v2576_v55 = vld [vmem:[%s4053_s0 + $0x34] sm:$0xf0]  ;;  %v2298_v56 = vld [vmem:[%s4053_s0 + $0x20] sm:$0xf]  ;;  %v2575_v58 = vld [vmem:[%s4053_s0 + $0x2c] sm:$0xf0] }
  0x4e   : > { %825 = vmatpush.bf16.msra.mxu3 %v2609_v21  ;;  %769 = vmatpush.bf16.msra.mxu1 %v2593_v22  ;;  %v2307_v57 = vor.u32 %v2576_v55, %v2306_v54  ;;  %v2574_v59 = vld [vmem:[%s4053_s0 + $0x2c] sm:$0xf]  ;;  %v2308_v60 = vld [vmem:[%s4053_s0 + $0x38] sm:$0xf0]  ;;  %v2573_v61 = vld [vmem:[%s4053_s0 + $0x24] sm:$0xf]  ;;  %v2299_v63 = vor.u32 %v2575_v58, %v2298_v56 }
  0x4f   : > { %2744 = vset.pattern.permute.xlu2 %v3076_v26  ;;  %v2300_v62 = vld [vmem:[%s4053_s0 + $0x30] sm:$0xf0]  ;;  %v2311_v3 = vor.u32 %v2574_v59, %v2308_v60  ;;  %v2322_v6 = vld [vmem:[%s4053_s0 + $0x48] sm:$0xf]  ;;  %v2580_v7 = vld [vmem:[%s4053_s0 + $0x54] sm:$0xf0] }
  0x50   : > { %2743 = vset.pattern.permute.xlu1 %v3076_v26  ;;  %921 = vperm.xlu0 %2740, %v3322_v23   ;;  %v2303_v4 = vor.u32 %v2573_v61, %v2300_v62  ;;  %v2314_v8 = vld [vmem:[%s4053_s0 + $0x40] sm:$0xf]  ;;  %v2323_v9 = vor.u32 %v2580_v7, %v2322_v6  ;;  %v2579_v10 = vld [vmem:[%s4053_s0 + $0x4c] sm:$0xf0]  ;;  %v2578_v11 = vld [vmem:[%s4053_s0 + $0x4c] sm:$0xf] }
  0x51   : > { %943 = vperm.xlu2 %2744, %v3293_v14   ;;  %939 = vperm.xlu1 %2743, %v3260_v2   ;;  %v2324_v15 = vld [vmem:[%s4053_s0 + $0x58] sm:$0xf0]  ;;  %v2577_v16 = vld [vmem:[%s4053_s0 + $0x44] sm:$0xf]  ;;  %v2316_v17 = vld [vmem:[%s4053_s0 + $0x50] sm:$0xf0]  ;;  %v2315_v18 = vor.u32 %v2579_v10, %v2314_v8 }
  0x52   : > { %798 = vmatpush.bf16.msra.mxu2 %v2600_v24  ;;  %742 = vmatpush.bf16.msra.mxu0 %v2584_v25  ;;  %v2327_v19 = vor.u32 %v2578_v11, %v2324_v15  ;;  %v2319_v20 = vor.u32 %v2577_v16, %v2316_v17  ;;  %v3079_v21 = vmov 4   ;;  %v403_v22 = vld [vmem:[%s4053_s0 + $0x68] sm:$0x11]  ;;  %v402_v25 = vld [vmem:[%s4053_s0 + $0x60] sm:$0x11]  ;;  %v3082_v38 = vmov 7  }
  0x53   : > { %826 = vmatpush.bf16.msra.mxu3 %v2608_v27  ;;  %770 = vmatpush.bf16.msra.mxu1 %v2592_v28  ;;  %v512_v24 = vunpack.c.l.b16 %v403_v22  ;;  %v513_v27 = vunpack.c.h.b16 %v403_v22  ;;  %v3084_v49 = vmov 0.0   ;;  %v3539_v55 = vld [vmem:[#allocation4] ss:$0 sm:$0xff] }
  0x54   : > { %859 = vst.msk [vmem:[#allocation2 + $0x8] sm:$0xff] %vm857_vm0, %v3084_v49 }
  0x55   : > { %v528_v28 = vpack.c.b16 %v512_v24, %v512_v24  ;;  %858 = vst.msk [vmem:[#allocation2] sm:$0xff] %vm857_vm0, %v3084_v49 }
  0x56   : > { %799 = vmatpush.bf16.msra.mxu2 %v2599_v29  ;;  %743 = vmatpush.bf16.msra.mxu0 %v2583_v30  ;;  %v3080_v29 = vmov 5   ;;  %v511_v30 = vunpack.c.h.b16 %v402_v25  ;;  %860 = vst.msk [vmem:[#allocation2 + $0x10] sm:$0xff] %vm857_vm0, %v3084_v49 }
  0x57   : > { %827 = vmatpush.bf16.msra.mxu3 %v2607_v31  ;;  %771 = vmatpush.bf16.msra.mxu1 %v2591_v32  ;;  %v529_v32 = vpack.c.b16 %v513_v27, %v513_v27  ;;  %861 = vst.msk [vmem:[#allocation2 + $0x18] sm:$0xff] %vm857_vm0, %v3084_v49 }
  0x58   : > { %2745 = vset.pattern.permute.xlu0 %v3076_v26  ;;  %v510_v26 = vunpack.c.l.b16 %v402_v25  ;;  %862 = vst.msk [vmem:[#allocation2 + $0x20] sm:$0xff] %vm857_vm0, %v3084_v49 }
  0x59   : > { %955 = vperm.xlu2 %2744, %v3256_v0   ;;  %951 = vperm.xlu1 %2743, %v3291_v13   ;;  %863 = vst.msk [vmem:[#allocation2 + $0x28] sm:$0xff] %vm857_vm0, %v3084_v49 }
  0x5a   : > { %947 = vperm.xlu0 %2745, %v3258_v1   ;;  %800 = vmatpush.bf16.msra.mxu2 %v2598_v33  ;;  %v526_v31 = vpack.c.b16 %v510_v26, %v510_v26  ;;  %v527_v33 = vpack.c.b16 %v511_v30, %v511_v30  ;;  %864 = vst.msk [vmem:[#allocation2 + $0x30] sm:$0xff] %vm857_vm0, %v3084_v49 }
  0x5b   : > { %744 = vmatpush.bf16.msra.mxu0 %v2582_v34  ;;  %828 = vmatpush.bf16.msra.mxu3 %v2606_v35  ;;  %v3081_v35 = vmov 6   ;;  %865 = vst.msk [vmem:[#allocation2 + $0x38] sm:$0xff] %vm857_vm0, %v3084_v49 }
  0x5c   : > { %772 = vmatpush.bf16.msra.mxu1 %v2590_v36 }
  0x5e   : > { %801 = vmatpush.bf16.msra.mxu2 %v2597_v37 }
  0x5f   : > { %745 = vmatpush.bf16.msra.mxu0 %v2581_v40  ;;  %829 = vmatpush.bf16.msra.mxu3 %v2605_v41  ;;  %v3083_v41 = vmov 8  }
  0x60   : > { %773 = vmatpush.bf16.msra.mxu1 %v2589_v42 }
  0x61   : > { %802 = vmatmul.bf16.vlgmr.msra.gmra.mxu2 %v2291_v46  ;;  %963 = vperm.xlu2 %2744, %v3322_v23  }
  0x62   : > { %959 = vperm.xlu1 %2743, %v3289_v12   ;;  %2746 = vset.pattern.permute.xlu0 %v3077_v53 }
  0x63   : > { %981 = vperm.xlu0 %2746, %v3260_v2   ;;  %746 = vmatmul.bf16.vlgmr.msra.gmra.mxu0 %v2283_v50 }
  0x64   : > { %830 = vmatmul.bf16.vlgmr.msra.gmra.mxu3 %v2295_v51  ;;  %774 = vmatmul.bf16.vlgmr.msra.gmra.mxu1 %v2287_v52 }
  0x69   : > { %2748 = vset.pattern.permute.xlu2 %v3077_v53 }
  0x6a   : > { %2747 = vset.pattern.permute.xlu1 %v3077_v53  ;;  %989 = vperm.xlu2 %2748, %v3258_v1  }
  0x6b   : > { %985 = vperm.xlu1 %2747, %v3293_v14   ;;  %1001 = vperm.xlu0 %2746, %v3289_v12  }
  0x71   : > { %807 = vmatmul.bf16.gmra.mxu2 %v2307_v57 }
  0x72   : > { %997 = vperm.xlu2 %2748, %v3256_v0  }
  0x73   : > { %993 = vperm.xlu1 %2747, %v3291_v13   ;;  %2750 = vset.pattern.permute.xlu0 %v3078_v5 }
  0x74   : > { %751 = vmatmul.bf16.gmra.mxu0 %v2299_v63  ;;  %835 = vmatmul.bf16.gmra.mxu3 %v2311_v3 }
  0x75   : > { %1027 = vperm.xlu0 %2750, %v3293_v14   ;;  %779 = vmatmul.bf16.gmra.mxu1 %v2303_v4 }
  0x7a   : > { %2749 = vset.pattern.permute.xlu2 %v3078_v5 }
  0x7b   : > { %1005 = vperm.xlu1 %2747, %v3322_v23   ;;  %1023 = vperm.xlu2 %2749, %v3260_v2  }
  0x7d   : > { %1047 = vperm.xlu0 %2750, %v3322_v23  }
  0x81   : > { %812 = vmatmul.bf16.gmra.mxu2 %v2323_v9 }
  0x83   : > { %2751 = vset.pattern.permute.xlu1 %v3078_v5  ;;  %1035 = vperm.xlu2 %2749, %v3291_v13  }
  0x84   : > { %756 = vmatmul.bf16.gmra.mxu0 %v2315_v18  ;;  %840 = vmatmul.bf16.gmra.mxu3 %v2327_v19 }
  0x85   : > { %1031 = vperm.xlu1 %2751, %v3258_v1   ;;  %2754 = vset.pattern.permute.xlu0 %v3079_v21 }
  0x86   : > { %1073 = vperm.xlu0 %2754, %v3258_v1   ;;  %784 = vmatmul.bf16.gmra.mxu1 %v2319_v20 }
  0x8b   : > { %1043 = vperm.xlu2 %2749, %v3289_v12  }
  0x8d   : > { %1039 = vperm.xlu1 %2751, %v3256_v0  }
  0x8e   : > { %2755 = vset.pattern.permute.xlu0 %v3080_v29 }
  0x8f   : > { %1107 = vperm.xlu0 %2755, %v3260_v2  }
  0x91   : > { %817 = vmatmul.bf16.gmra.mxu2 %v528_v28 }
  0x93   : > { %2753 = vset.pattern.permute.xlu2 %v3079_v21 }
  0x94   : > { %761 = vmatmul.bf16.gmra.mxu0 %v526_v31  ;;  %845 = vmatmul.bf16.gmra.mxu3 %v529_v32 }
  0x95   : > { %2752 = vset.pattern.permute.xlu1 %v3079_v21  ;;  %1069 = vperm.xlu2 %2753, %v3293_v14  }
  0x96   : > { %1065 = vperm.xlu1 %2752, %v3260_v2   ;;  %789 = vmatmul.bf16.gmra.mxu1 %v527_v33 }
  0x97   : > { %1127 = vperm.xlu0 %2755, %v3289_v12  }
  0x99   : > { %v3477_v34 = vpop.permute.xlu2 %911 }
  0x9d   : > { %1081 = vperm.xlu2 %2753, %v3256_v0  }
  0x9e   : > { %1077 = vperm.xlu1 %2752, %v3291_v13  }
  0x9f   : > { %2759 = vset.pattern.permute.xlu0 %v3081_v35 }
  0xa0   : > { %1153 = vperm.xlu0 %2759, %v3293_v14  }
  0xa1   : > { %v3482_v36 = vpop.permute.xlu2 %916 }
  0xa5   : > { %1089 = vperm.xlu2 %2753, %v3322_v23  }
  0xa6   : > { %1085 = vperm.xlu1 %2752, %v3289_v12  }
  0xa8   : > { %1173 = vperm.xlu0 %2759, %v3322_v23  }
  0xab   : > { %v3487_v37 = vpop.permute.xlu2 %943 }
  0xad   : > { %2757 = vset.pattern.permute.xlu2 %v3080_v29 }
  0xae   : > { %2756 = vset.pattern.permute.xlu1 %v3080_v29  ;;  %1115 = vperm.xlu2 %2757, %v3258_v1  }
  0xaf   : > { %1111 = vperm.xlu1 %2756, %v3293_v14  }
  0xb0   : > { %2763 = vset.pattern.permute.xlu0 %v3082_v38 }
  0xb1   : > { %1199 = vperm.xlu0 %2763, %v3258_v1  }
  0xb2   : > { %v3492_v39 = vpop.permute.xlu1 %901  ;;  %v3506_v44 = vpop.permute.xlu0 %891 }
  0xb3   : > { %v3494_v40 = vpop.permute.xlu2 %955 }
  0xb6   : > { %1123 = vperm.xlu2 %2757, %v3256_v0  }
  0xb7   : > { %1119 = vperm.xlu1 %2756, %v3291_v13  }
  0xb9   : > { %2764 = vset.pattern.permute.xlu0 %v3083_v41 }
  0xba   : > { %1233 = vperm.xlu0 %2764, %v3260_v2   ;;  %v3500_v42 = vpop.permute.xlu1 %906  ;;  %v3515_v47 = vpop.permute.xlu0 %896 }
  0xbb   : > { %v3502_v43 = vpop.permute.xlu2 %963 }
  0xbe   : > { %2758 = vset.pattern.permute.xlu2 %v3081_v35 }
  0xbf   : > { %1131 = vperm.xlu1 %2756, %v3322_v23   ;;  %1149 = vperm.xlu2 %2758, %v3260_v2  }
  0xc2   : > { %1253 = vperm.xlu0 %2764, %v3289_v12   ;;  %v3533_v52 = vpop.permute.xlu0 %921 }
  0xc3   : > { %v3509_v45 = vpop.permute.xlu1 %939 }
  0xc4   : > { %v3511_v46 = vpop.permute.xlu2 %989 }
  0xc7   : > { %2760 = vset.pattern.permute.xlu1 %v3081_v35  ;;  %1161 = vperm.xlu2 %2758, %v3291_v13  }
  0xc8   : > { %1157 = vperm.xlu1 %2760, %v3258_v1  }
  0xcb   : > { %v3517_v48 = vpop.permute.xlu1 %951 }
  0xcc   : > { %v3520_v50 = vpop.permute.xlu2 %997  ;;  %v3543_v57 = vpop.permute.xlu0 %947 }
  0xcf   : > { %1169 = vperm.xlu2 %2758, %v3289_v12  }
  0xd0   : > { %1165 = vperm.xlu1 %2760, %v3256_v0  }
  0xd4   : > { %v3531_v51 = vpop.permute.xlu1 %959 }
  0xd5   : > { %v3535_v53 = vpop.permute.xlu2 %1023  ;;  %v982_v7 = vpop.permute.xlu0 %981 }
  0xd7   : > { %2762 = vset.pattern.permute.xlu2 %v3082_v38 }
  0xd8   : > { %2761 = vset.pattern.permute.xlu1 %v3082_v38  ;;  %1195 = vperm.xlu2 %2762, %v3293_v14  }
  0xd9   : > { %1191 = vperm.xlu1 %2761, %v3260_v2  }
  0xdd   : > { %v986_v54 = vpop.permute.xlu1 %985  ;;  %v3541_v56 = vpop.permute.xlu2 %1035 }
  0xde   : > { %v3565_v25 = vpop.permute.xlu0 %1001 }
  0xe0   : > { %1207 = vperm.xlu2 %2762, %v3256_v0   ;;  %v747_v58 = vpop.f32.mrf.mxu0 }
  0xe1   : > { %1203 = vperm.xlu1 %2761, %v3291_v13   ;;  %v748_v59 = vadd.f32 %v3539_v55, %v747_v58  ;;  %v775_v60 = vpop.f32.mrf.mxu1 }
  0xe3   : > { %v776_v61 = vadd.f32 %v775_v60, %v748_v59 }
  0xe4   : > { %v803_v62 = vpop.f32.mrf.mxu2 }
  0xe5   : > { %v804_v63 = vadd.f32 %v803_v62, %v776_v61  ;;  %v3548_v3 = vpop.permute.xlu1 %993  ;;  %v3550_v2 = vpop.permute.xlu2 %1043 }
  0xe7   : > { %v831_v4 = vpop.f32.mrf.mxu3 }
  0xe8   : > { %v832_v5 = vadd.f32 %v831_v4, %v804_v63  ;;  %1215 = vperm.xlu2 %2762, %v3322_v23   ;;  %v749_v6 = vpop.f32.mrf.mxu0  ;;  %v1028_v63 = vpop.permute.xlu0 %1027 }
  0xe9   : > { %1211 = vperm.xlu1 %2761, %v3289_v12   ;;  %v750_v8 = vadd.f32 %v3539_v55, %v749_v6  ;;  %v777_v9 = vpop.f32.mrf.mxu1 }
  0xea   : > { %v850_v10 = vmax.f32 %v832_v5, 0.0 }
  0xeb   : > { %v778_v11 = vadd.f32 %v777_v9, %v750_v8 }
  0xec   : > { %868 = vst.msk [vmem:[#allocation2 + $0x8] sm:$0xff] %vm857_vm0, %v850_v10  ;;  %v805_v15 = vpop.f32.mrf.mxu2 }
  0xed   : > { %v806_v16 = vadd.f32 %v805_v15, %v778_v11  ;;  %v3556_v17 = vpop.permute.xlu1 %1005 }
  0xef   : > { %v833_v18 = vpop.f32.mrf.mxu3  ;;  %v3558_v19 = vpop.permute.xlu2 %1069 }
  0xf0   : > { %v834_v20 = vadd.f32 %v833_v18, %v806_v16  ;;  %2766 = vset.pattern.permute.xlu2 %v3083_v41 }
  0xf1   : > { %2765 = vset.pattern.permute.xlu1 %v3083_v41  ;;  %v752_v12 = vpop.f32.mrf.mxu0  ;;  %1241 = vperm.xlu2 %2766, %v3258_v1  }
  0xf2   : > { %v851_v21 = vmax.f32 %v834_v20, 0.0  ;;  %v753_v22 = vadd.f32 %v3539_v55, %v752_v12  ;;  %1237 = vperm.xlu1 %2765, %v3293_v14   ;;  %v780_v24 = vpop.f32.mrf.mxu1 }
  0xf3   : > { %v973_v31 = vld [vmem:[#allocation2 + $0x4] sm:$0xff] }
  0xf4   : > { %869 = vst.msk [vmem:[#allocation2 + $0x10] sm:$0xff] %vm857_vm0, %v851_v21  ;;  %v781_v26 = vadd.f32 %v780_v24, %v753_v22  ;;  %v808_v27 = vpop.f32.mrf.mxu2  ;;  %v1008_v41 = vmul.f32 %v982_v7, %v973_v31  ;;  %v931_v49 = vld [vmem:[#allocation2 + $0x3] sm:$0xff] }
  0xf5   : > { %v1015_v11 = vld [vmem:[#allocation2 + $0x7] sm:$0xff] }
  0xf6   : > { %v809_v28 = vadd.f32 %v808_v27, %v781_v26  ;;  %v1050_v21 = vmul.f32 %v3535_v53, %v1015_v11  ;;  %v1057_v26 = vld [vmem:[#allocation2 + $0x8] sm:$0xff] }
  0xf7   : > { %v3568_v29 = vpop.permute.xlu1 %1031  ;;  %v836_v30 = vpop.f32.mrf.mxu3 }
  0xf8   : > { %v837_v32 = vadd.f32 %v836_v30, %v809_v28  ;;  %v3570_v33 = vpop.permute.xlu2 %1081  ;;  %v3592_v28 = vpop.permute.xlu0 %1047 }
  0xf9   : > { %v754_v1 = vpop.f32.mrf.mxu0  ;;  %1249 = vperm.xlu2 %2766, %v3256_v0   ;;  %v966_v0 = vmul.f32 %v3509_v45, %v931_v49 }
  0xfa   : > { %v852_v35 = vmax.f32 %v837_v32, 0.0  ;;  %v755_v14 = vadd.f32 %v3539_v55, %v754_v1  ;;  %1245 = vperm.xlu1 %2765, %v3291_v13   ;;  %v782_v38 = vpop.f32.mrf.mxu1 }
  0xfb   : > { %v3575_v58 = vld [vmem:[#allocation2 + $0xc] sm:$0xff] }
  0xfc   : > { %870 = vst.msk [vmem:[#allocation2 + $0x18] sm:$0xff] %vm857_vm0, %v852_v35  ;;  %v783_v59 = vadd.f32 %v782_v38, %v755_v14  ;;  %v810_v60 = vpop.f32.mrf.mxu2  ;;  %v1009_v61 = vmul.f32 %v986_v54, %v3575_v58  ;;  %v932_v62 = vld [vmem:[#allocation2 + $0xb] sm:$0xff] }
  0xfd   : > { %v967_v4 = vmul.f32 %v3487_v37, %v932_v62  ;;  %v1016_v45 = vld [vmem:[#allocation2 + $0xf] sm:$0xff] }
  0xfe   : > { %v811_v5 = vadd.f32 %v810_v60, %v783_v59  ;;  %v2772_v13 = vpack.i.bf16 %v1009_v61, %v1008_v41  ;;  %v1058_v18 = vld [vmem:[#allocation2 + $0x10] sm:$0xff]  ;;  %v1051_v22 = vmul.f32 %v1028_v63, %v1016_v45 }
  0xff   : > { %v3581_v6 = vpop.permute.xlu1 %1039  ;;  %v838_v7 = vpop.f32.mrf.mxu3  ;;  %v2767_v8 = vpack.i.bf16 %v967_v4, %v966_v0  ;;  %v1093_v27 = vmul.f32 %v3558_v19, %v1058_v18 }
 0x100   : > { %v839_v9 = vadd.f32 %v838_v7, %v811_v5  ;;  %2773 = vrot.lane.b32.xlu0 %v2772_v13, %s3085_s12  ;;  %v3584_v10 = vpop.permute.xlu2 %1089  ;;  %v2777_v35 = vpack.i.bf16 %v1051_v22, %v1050_v21 }
 0x101   : > { %v757_v54 = vpop.f32.mrf.mxu0  ;;  %2768 = vrot.lane.b32.xlu2 %v2767_v8, %s3086_s6 }
 0x102   : > { %v853_v15 = vmax.f32 %v839_v9, 0.0  ;;  %v758_v37 = vadd.f32 %v3539_v55, %v757_v54  ;;  %1257 = vperm.xlu1 %2765, %v3322_v23  }
 0x103   : > { %v785_v16 = vpop.f32.mrf.mxu1  ;;  %v933_v31 = vld [vmem:[#allocation2 + $0x13] sm:$0xff] }
 0x104   : > { %871 = vst.msk [vmem:[#allocation2 + $0x20] sm:$0xff] %vm857_vm0, %v853_v15  ;;  %v786_v20 = vadd.f32 %v785_v16, %v758_v37  ;;  %v813_v12 = vpop.f32.mrf.mxu2  ;;  %v968_v53 = vmul.f32 %v3543_v57, %v933_v31  ;;  %v3599_v61 = vld [vmem:[#allocation2 + $0x14] sm:$0xff]  ;;  %v1074_v16 = vpop.permute.xlu0 %1073 }
 0x105   : > { %v1010_v8 = vmul.f32 %v3599_v61, %v3511_v46  ;;  %v1017_v9 = vld [vmem:[#allocation2 + $0x17] sm:$0xff] }
 0x106   : > { %v814_v24 = vadd.f32 %v813_v12, %v786_v20 }
 0x107   : > { %v841_v30 = vpop.f32.mrf.mxu3 }
 0x108   : > { %v842_v32 = vadd.f32 %v841_v30, %v814_v24  ;;  %v1066_v1 = vpop.permute.xlu1 %1065  ;;  %v3594_v23 = vpop.permute.xlu2 %1115 }
 0x109   : > { %v1092_v14 = vmul.f32 %v1066_v1, %v1057_v26  ;;  %v759_v38 = vpop.f32.mrf.mxu0 }
 0x10a   : > { %v854_v41 = vmax.f32 %v842_v32, 0.0  ;;  %v760_v49 = vadd.f32 %v3539_v55, %v759_v38  ;;  %2778 = vrot.lane.b32.xlu1 %v2777_v35, %s3087_s26 }
 0x10b   : > { %v2782_v19 = vpack.i.bf16 %v1093_v27, %v1092_v14  ;;  %v787_v59 = vpop.f32.mrf.mxu1  ;;  %v934_v60 = vld [vmem:[#allocation2 + $0x1b] sm:$0xff] }
 0x10c   : > { %872 = vst.msk [vmem:[#allocation2 + $0x28] sm:$0xff] %vm857_vm0, %v854_v41  ;;  %v788_v62 = vadd.f32 %v787_v59, %v760_v49  ;;  %v815_v63 = vpop.f32.mrf.mxu2  ;;  %v969_v0 = vmul.f32 %v3517_v48, %v934_v60  ;;  %v3603_v4 = vld [vmem:[#allocation2 + $0x1c] sm:$0xff] }
 0x10d   : > { %v1018_v5 = vld [vmem:[#allocation2 + $0x1f] sm:$0xff]  ;;  %2783 = vrot.lane.b32.xlu2 %v2782_v19, %s3088_s28  ;;  %v1011_v57 = vmul.f32 %v3548_v3, %v3603_v4  ;;  %v1052_v3 = vmul.f32 %v3568_v29, %v1017_v9 }
 0x10e   : > { %v816_v13 = vadd.f32 %v815_v63, %v788_v62  ;;  %v2787_v7 = vpack.i.bf16 %v969_v0, %v968_v53  ;;  %v1053_v11 = vmul.f32 %v3541_v56, %v1018_v5 }
 0x10f   : > { %v843_v54 = vpop.f32.mrf.mxu3  ;;  %v2792_v37 = vpack.i.bf16 %v1011_v57, %v1010_v8 }
 0x110   : > { %v844_v45 = vadd.f32 %v843_v54, %v816_v13  ;;  %v3611_v48 = vpop.permute.xlu1 %1077  ;;  %2788 = vrot.lane.b32.xlu0 %v2787_v7, %s3086_s6  ;;  %v3614_v15 = vpop.permute.xlu2 %1123  ;;  %v2797_v21 = vpack.i.bf16 %v1053_v11, %v1052_v3  ;;  %v1060_v3 = vld [vmem:[#allocation2 + $0x20] sm:$0xff] }
 0x111   : > { %v762_v18 = vpop.f32.mrf.mxu0 }
 0x112   : > { %v855_v20 = vmax.f32 %v844_v45, 0.0  ;;  %v763_v12 = vadd.f32 %v3539_v55, %v762_v18  ;;  %2793 = vrot.lane.b32.xlu1 %v2792_v37, %s3085_s12  ;;  %v1108_v55 = vpop.permute.xlu0 %1107  ;;  %v1059_v37 = vld [vmem:[#allocation2 + $0x18] sm:$0xff] }
 0x113   : > { %v790_v46 = vpop.f32.mrf.mxu1  ;;  %v935_v1 = vld [vmem:[#allocation2 + $0x23] sm:$0xff] }
 0x114   : > { %873 = vst.msk [vmem:[#allocation2 + $0x30] sm:$0xff] %vm857_vm0, %v855_v20  ;;  %v791_v56 = vadd.f32 %v790_v46, %v763_v12  ;;  %v818_v22 = vpop.f32.mrf.mxu2  ;;  %v970_v59 = vmul.f32 %v3494_v40, %v935_v1  ;;  %v1019_v5 = vld [vmem:[#allocation2 + $0x27] sm:$0xff]  ;;  %v1094_v46 = vmul.f32 %v1074_v16, %v1059_v37 }
 0x115   : > { %2798 = vrot.lane.b32.xlu2 %v2797_v21, %s3087_s26  ;;  %v1144_v13 = vld [vmem:[#allocation2 + $0x24] sm:$0xff]  ;;  %v1054_v9 = vmul.f32 %v3581_v6, %v1019_v5 }
 0x116   : > { %v819_v24 = vadd.f32 %v818_v22, %v791_v56  ;;  %v1061_v8 = vld [vmem:[#allocation2 + $0x28] sm:$0xff]  ;;  %v1012_v11 = vmul.f32 %v1144_v13, %v3520_v50 }
 0x117   : > { %v846_v26 = vpop.f32.mrf.mxu3  ;;  %v1096_v20 = vmul.f32 %v3570_v33, %v1061_v8  ;;  %v1147_v8 = vld [vmem:[#allocation2 + $0x3c] sm:$0x3] }
 0x118   : > { %v847_v27 = vadd.f32 %v846_v26, %v819_v24  ;;  %v1086_v30 = vpop.permute.xlu1 %1085 }
 0x119   : > { %v3621_v31 = vpop.permute.xlu2 %1149  ;;  %v764_v29 = vpop.f32.mrf.mxu0 }
 0x11a   : > { %v856_v32 = vmax.f32 %v847_v27, 0.0  ;;  %v1128_v18 = vpop.permute.xlu0 %1127  ;;  %v1099_v27 = vld [vmem:[#allocation2 + $0x9] sm:$0xff]  ;;  %v1100_v29 = vld [vmem:[#allocation2 + $0x11] sm:$0xff] }
 0x11b   : > { %v979_v35 = vld [vmem:[#allocation2 + $0x34] sm:$0x3]  ;;  %v792_v14 = vpop.f32.mrf.mxu1  ;;  %v936_v49 = vld [vmem:[#allocation2 + $0x2b] sm:$0xff] }
 0x11c   : > { %874 = vst.msk [vmem:[#allocation2 + $0x38] sm:$0x3] %vm866_vm1, %v856_v32  ;;  %v1014_v38 = vmul.f32 %v3556_v17, %v979_v35  ;;  %v937_v41 = vld [vmem:[#allocation2 + $0x33] sm:$0x3]  ;;  %v820_v53 = vpop.f32.mrf.mxu2  ;;  %v971_v60 = vmul.f32 %v3531_v51, %v936_v49  ;;  %v1103_v26 = vld [vmem:[#allocation2 + $0x29] sm:$0xff]  ;;  %v1134_v14 = vmul.f32 %v1108_v55, %v1099_v27  ;;  %v1176_v55 = vmul.f32 %v3621_v31, %v3575_v58 }
 0x11d   : > { %v972_v19 = vmul.f32 %v3502_v43, %v937_v41  ;;  %v1020_v62 = vld [vmem:[#allocation2 + $0x2f] sm:$0xff]  ;;  %v1138_v32 = vmul.f32 %v3614_v15, %v1103_v26  ;;  %v875_v26 = vld [vmem:[#allocation2 + $0x2] sm:$0xff] }
 0x11e   : > { %1314 = vrot.lane.b32.xlu0 %v1014_v38, %s3085_s12  ;;  %v3629_v63 = vld [vmem:[#allocation2 + $0x2c] sm:$0xff]  ;;  %v2802_v0 = vpack.i.bf16 %v971_v60, %v970_v59  ;;  %v1055_v7 = vmul.f32 %v3550_v2, %v1020_v62  ;;  %v1102_v38 = vld [vmem:[#allocation2 + $0x21] sm:$0xff] }
 0x11f   : > { %1286 = vrot.lane.b32.xlu2 %v972_v19, %s3086_s6  ;;  %v848_v57 = vpop.f32.mrf.mxu3  ;;  %v1062_v17 = vld [vmem:[#allocation2 + $0x30] sm:$0xff]  ;;  %v1013_v51 = vmul.f32 %v3565_v25, %v3629_v63  ;;  %v1095_v25 = vmul.f32 %v3611_v48, %v1060_v3 }
 0x120   : > { %2803 = vrot.lane.b32.xlu1 %v2802_v0, %s3086_s6  ;;  %v1097_v54 = vmul.f32 %v1086_v30, %v1062_v17  ;;  %v2812_v45 = vpack.i.bf16 %v1055_v7, %v1054_v9  ;;  %v1229_v27 = vld [vmem:[#allocation2 + $0x2e] sm:$0xff] }
 0x121   : > { %v1112_v43 = vpop.permute.xlu1 %1111  ;;  %v1162_v40 = vpop.permute.xlu2 %1161  ;;  %v2807_v2 = vpack.i.bf16 %v1013_v51, %v1012_v11  ;;  %v2817_v56 = vpack.i.bf16 %v1095_v25, %v1094_v46  ;;  %v1185_v46 = vld [vmem:[#allocation2 + $0x1d] sm:$0xff] }
 0x122   : > { %v2827_v12 = vpack.i.bf16 %v1097_v54, %v1096_v20  ;;  %v1154_v30 = vpop.permute.xlu0 %1153  ;;  %v1135_v16 = vmul.f32 %v1112_v43, %v1100_v29  ;;  %v1179_v5 = vmul.f32 %v1162_v40, %v1144_v13  ;;  %v1183_v40 = vld [vmem:[#allocation2 + $0xd] sm:$0xff] }
 0x123   : > { %v1063_v50 = vld [vmem:[#allocation2 + $0x38] sm:$0x3]  ;;  %v1177_v7 = vmul.f32 %v1154_v30, %v3599_v61 }
 0x124   : > { %v1021_v22 = vld [vmem:[#allocation2 + $0x37] sm:$0x3]  ;;  %v1098_v24 = vmul.f32 %v3584_v10, %v1063_v50  ;;  %v1101_v10 = vld [vmem:[#allocation2 + $0x19] sm:$0xff]  ;;  %v2822_v53 = vpack.i.bf16 %v1135_v16, %v1134_v14  ;;  %v1187_v16 = vld [vmem:[#allocation2 + $0x2d] sm:$0xff]  ;;  %v924_v14 = vmul.f32 %v3506_v44, %v875_v26 }
 0x125   : > { %v1104_v33 = vld [vmem:[#allocation2 + $0x31] sm:$0xff]  ;;  %v1056_v48 = vmul.f32 %v3592_v28, %v1021_v22  ;;  %v1136_v19 = vmul.f32 %v3594_v23, %v1101_v10  ;;  %v1105_v62 = vld [vmem:[#allocation2 + $0x39] sm:$0x3]  ;;  %v2842_v43 = vpack.i.bf16 %v1177_v7, %v1176_v55 }
 0x126   : > { %2813 = vrot.lane.b32.xlu0 %v2812_v45, %s3087_s26  ;;  %v1139_v35 = vmul.f32 %v1128_v18, %v1104_v33  ;;  %v1146_v51 = vld [vmem:[#allocation2 + $0x34] sm:$0xff]  ;;  %v876_v33 = vld [vmem:[#allocation2 + $0xa] sm:$0xff] }
 0x127   : > { %2808 = vrot.lane.b32.xlu2 %v2807_v2, %s3085_s12  ;;  %v1230_v30 = vld [vmem:[#allocation2 + $0x36] sm:$0xff]  ;;  %v925_v10 = vmul.f32 %v3515_v47, %v876_v33 }
 0x128   : > { %2828 = vrot.lane.b32.xlu1 %v2827_v12, %s3088_s28  ;;  %v2837_v59 = vpack.i.bf16 %v1139_v35, %v1138_v32  ;;  %v1189_v12 = vld [vmem:[#allocation2 + $0x3d] sm:$0x3] }
 0x129   : > { %v1120_v6 = vpop.permute.xlu1 %1119  ;;  %v1170_v21 = vpop.permute.xlu2 %1169  ;;  %v1226_v55 = vld [vmem:[#allocation2 + $0x16] sm:$0xff] }
 0x12a   : > { %v1137_v49 = vmul.f32 %v1120_v6, %v1102_v38  ;;  %v1174_v28 = vpop.permute.xlu0 %1173  ;;  %v1181_v11 = vmul.f32 %v1170_v21, %v1146_v51 }
 0x12b   : > { %v1182_v31 = vmul.f32 %v1174_v28, %v1147_v8  ;;  %v1231_v8 = vld [vmem:[#allocation2 + $0x3e] sm:$0x3] }
 0x12c   : > { %v2832_v60 = vpack.i.bf16 %v1137_v49, %v1136_v19 }
 0x12e   : > { %2818 = vrot.lane.b32.xlu0 %v2817_v56, %s3088_s28 }
 0x12f   : > { %1370 = vrot.lane.b32.xlu2 %v1098_v24, %s3088_s28 }
 0x130   : > { %1342 = vrot.lane.b32.xlu1 %v1056_v48, %s3087_s26 }
 0x131   : > { %v1132_v1 = vpop.permute.xlu1 %1131 }
 0x132   : > { %v1196_v41 = vpop.permute.xlu2 %1195  ;;  %v1140_v17 = vmul.f32 %v1132_v1, %v1105_v62  ;;  %v1200_v58 = vpop.permute.xlu0 %1199  ;;  %v1188_v1 = vld [vmem:[#allocation2 + $0x35] sm:$0xff] }
 0x133   : > { %v1220_v21 = vmul.f32 %v1200_v58, %v1185_v46  ;;  %v1225_v62 = vld [vmem:[#allocation2 + $0xe] sm:$0xff] }
 0x134   : > { %v877_v46 = vld [vmem:[#allocation2 + $0x12] sm:$0xff] }
 0x136   : > { %2823 = vrot.lane.b32.xlu0 %v2822_v53, %s3089_s4 }
 0x137   : > { %2838 = vrot.lane.b32.xlu2 %v2837_v59, %s3089_s4 }
 0x138   : > { %2833 = vrot.lane.b32.xlu1 %v2832_v60, %s3089_s4 }
 0x13a   : > { %v1158_v15 = vpop.permute.xlu1 %1157  ;;  %v1208_v0 = vpop.permute.xlu2 %1207 }
 0x13b   : > { %v1178_v57 = vmul.f32 %v1158_v15, %v3603_v4  ;;  %v1184_v4 = vld [vmem:[#allocation2 + $0x15] sm:$0xff]  ;;  %v1234_v20 = vpop.permute.xlu0 %1233  ;;  %v1222_v38 = vmul.f32 %v1208_v0, %v1187_v16  ;;  %v1227_v0 = vld [vmem:[#allocation2 + $0x1e] sm:$0xff] }
 0x13c   : > { %v1219_v18 = vmul.f32 %v1196_v41, %v1184_v4  ;;  %v1260_v44 = vmul.f32 %v1234_v20, %v1225_v62 }
 0x13d   : > { %v2847_v23 = vpack.i.bf16 %v1179_v5, %v1178_v57 }
 0x13e   : > { %1398 = vrot.lane.b32.xlu0 %v1140_v17, %s3089_s4  ;;  %v1228_v17 = vld [vmem:[#allocation2 + $0x26] sm:$0xff] }
 0x13f   : > { %2848 = vrot.lane.b32.xlu2 %v2847_v23, %s3090_s23 }
 0x140   : > { %2843 = vrot.lane.b32.xlu1 %v2842_v43, %s3090_s23 }
 0x142   : > { %v1166_v9 = vpop.permute.xlu1 %1165  ;;  %v1216_v54 = vpop.permute.xlu2 %1215 }
 0x143   : > { %v1180_v45 = vmul.f32 %v1166_v9, %v3629_v63  ;;  %v1186_v63 = vld [vmem:[#allocation2 + $0x25] sm:$0xff]  ;;  %v1224_v50 = vmul.f32 %v1216_v54, %v1189_v12  ;;  %v1254_v24 = vpop.permute.xlu0 %1253 }
 0x144   : > { %v1265_v48 = vmul.f32 %v1254_v24, %v1230_v30 }
 0x145   : > { %v2852_v13 = vpack.i.bf16 %v1181_v11, %v1180_v45 }
 0x147   : > { %2853 = vrot.lane.b32.xlu0 %v2852_v13, %s3090_s23 }
 0x148   : > { %1426 = vrot.lane.b32.xlu1 %v1182_v31, %s3090_s23 }
 0x14b   : > { %v1192_v61 = vpop.permute.xlu1 %1191  ;;  %v1242_v37 = vpop.permute.xlu2 %1241 }
 0x14c   : > { %v1218_v3 = vmul.f32 %v1192_v61, %v1183_v40  ;;  %v1262_v7 = vmul.f32 %v1242_v37, %v1227_v0  ;;  %v879_v0 = vld [vmem:[#allocation2 + $0x22] sm:$0xff] }
 0x14e   : > { %v2857_v2 = vpack.i.bf16 %v1219_v18, %v1218_v3 }
 0x150   : > { %2858 = vrot.lane.b32.xlu2 %v2857_v2, %s3091_s9 }
 0x153   : > { %v1204_v25 = vpop.permute.xlu1 %1203  ;;  %v1250_v6 = vpop.permute.xlu2 %1249 }
 0x154   : > { %v1221_v56 = vmul.f32 %v1204_v25, %v1186_v63  ;;  %v1264_v29 = vmul.f32 %v1250_v6, %v1229_v27  ;;  %v878_v25 = vld [vmem:[#allocation2 + $0x1a] sm:$0xff] }
 0x156   : > { %v2862_v22 = vpack.i.bf16 %v1221_v56, %v1220_v21  ;;  %v2882_v19 = vpack.i.bf16 %v1265_v48, %v1264_v29  ;;  %v926_v56 = vmul.f32 %v3492_v39, %v877_v46 }
 0x158   : > { %2863 = vrot.lane.b32.xlu0 %v2862_v22, %s3091_s9  ;;  %1454 = vrot.lane.b32.xlu2 %v1224_v50, %s3091_s9  ;;  %v927_v22 = vmul.f32 %v3500_v42, %v878_v25  ;;  %v881_v42 = vld [vmem:[#allocation2 + $0x32] sm:$0x3] }
 0x15b   : > { %v1212_v32 = vpop.permute.xlu1 %1211  ;;  %v2769_v35 = vpop.permute.xlu2 %2768 }
 0x15c   : > { %v1223_v41 = vmul.f32 %v1212_v32, %v1188_v1  ;;  %v2771_v49 = vunpack.i.h.bf16 %v2769_v35  ;;  %v2770_v53 = vunpack.i.l.bf16 %v2769_v35 }
 0x15e   : > { %v2867_v59 = vpack.i.bf16 %v1223_v41, %v1222_v38  ;;  %v1491_v60 = vsel %vm857_vm0, %v924_v14, %v2770_v53  ;;  %v1492_v28 = vsel %vm857_vm0, %v925_v10, %v2771_v49  ;;  %v930_v14 = vmul.f32 %v3533_v52, %v881_v42 }
 0x160   : > { %2868 = vrot.lane.b32.xlu1 %v2867_v59, %s3091_s9  ;;  %2883 = vrot.lane.b32.xlu2 %v2882_v19, %s3092_s10 }
 0x164   : > { %v1238_v15 = vpop.permute.xlu1 %1237 }
 0x165   : > { %v1261_v5 = vmul.f32 %v1238_v15, %v1226_v55 }
 0x167   : > { %v2872_v47 = vpack.i.bf16 %v1261_v5, %v1260_v44  ;;  %v2784_v13 = vpop.permute.xlu2 %2783 }
 0x168   : > { %v2786_v37 = vunpack.i.h.bf16 %v2784_v13  ;;  %v2785_v18 = vunpack.i.l.bf16 %v2784_v13 }
 0x169   : > { %2873 = vrot.lane.b32.xlu0 %v2872_v47, %s3092_s10 }
 0x16c   : > { %v1246_v57 = vpop.permute.xlu1 %1245 }
 0x16d   : > { %v1263_v23 = vmul.f32 %v1246_v57, %v1228_v17  ;;  %v880_v57 = vld [vmem:[#allocation2 + $0x2a] sm:$0xff] }
 0x16f   : > { %v2877_v43 = vpack.i.bf16 %v1263_v23, %v1262_v7  ;;  %v2799_v6 = vpop.permute.xlu2 %2798 }
 0x170   : > { %v2801_v27 = vunpack.i.h.bf16 %v2799_v6  ;;  %v2800_v30 = vunpack.i.l.bf16 %v2799_v6 }
 0x171   : > { %2878 = vrot.lane.b32.xlu1 %v2877_v43, %s3092_s10  ;;  %v928_v43 = vmul.f32 %v3477_v34, %v879_v0 }
 0x172   : > { %v2774_v51 = vpop.permute.xlu0 %2773 }
 0x173   : > { %v2776_v9 = vunpack.i.h.bf16 %v2774_v51  ;;  %v2775_v54 = vunpack.i.l.bf16 %v2774_v51  ;;  %v929_v51 = vmul.f32 %v3482_v36, %v880_v57 }
 0x174   : > { %v1258_v11 = vpop.permute.xlu1 %1257 }
 0x175   : > { %v1499_v45 = vsel %vm1498_vm2, %v1491_v60, %v2775_v54  ;;  %v1500_v58 = vsel %vm1498_vm2, %v1492_v28, %v2776_v9  ;;  %v1266_v31 = vmul.f32 %v1258_v11, %v1231_v8 }
 0x177   : > { %1482 = vrot.lane.b32.xlu0 %v1266_v31, %s3092_s10 }
 0x179   : > { %v1287_v35 = vpop.permute.xlu2 %1286 }
 0x17a   : > { %v1497_v10 = vsel %vm857_vm0, %v930_v14, %v1287_v35 }
 0x17c   : > { %v2779_v4 = vpop.permute.xlu1 %2778 }
 0x17d   : > { %v2781_v61 = vunpack.i.h.bf16 %v2779_v4  ;;  %v2780_v40 = vunpack.i.l.bf16 %v2779_v4 }
 0x17f   : > { %v1507_v3 = vsel %vm1506_vm3, %v1499_v45, %v2780_v40  ;;  %v1508_v20 = vsel %vm1506_vm3, %v1500_v58, %v2781_v61 }
 0x180   : > { %v3668_v2 = vsel %vm1514_vm4, %v1507_v3, %v2785_v18  ;;  %v3671_v12 = vsel %vm1514_vm4, %v1508_v20, %v2786_v37 }
 0x181   : > { %v2809_v53 = vpop.permute.xlu2 %2808 }
 0x182   : > { %v2789_v63 = vpop.permute.xlu0 %2788  ;;  %v2811_v58 = vunpack.i.h.bf16 %v2809_v53  ;;  %v2810_v31 = vunpack.i.l.bf16 %v2809_v53 }
 0x183   : > { %v2791_v21 = vunpack.i.h.bf16 %v2789_v63  ;;  %v2790_v50 = vunpack.i.l.bf16 %v2789_v63 }
 0x184   : > { %v2794_v24 = vpop.permute.xlu1 %2793 }
 0x185   : > { %v2796_v26 = vunpack.i.h.bf16 %v2794_v24  ;;  %v2795_v33 = vunpack.i.l.bf16 %v2794_v24  ;;  %v1494_v29 = vsel %vm857_vm0, %v927_v22, %v2791_v21  ;;  %v1493_v48 = vsel %vm857_vm0, %v926_v56, %v2790_v50 }
 0x187   : > { %v1501_v16 = vsel %vm1498_vm2, %v1493_v48, %v2795_v33  ;;  %v1502_v32 = vsel %vm1498_vm2, %v1494_v29, %v2796_v26 }
 0x188   : > { %v3680_v1 = vsel %vm1506_vm3, %v1501_v16, %v2800_v30  ;;  %v3683_v39 = vsel %vm1506_vm3, %v1502_v32, %v2801_v27 }
 0x189   : > { %v3690_v59 = vpop.permute.xlu2 %1370 }
 0x190   : > { %v1315_v38 = vpop.permute.xlu0 %1314 }
 0x191   : > { %v3688_v41 = vsel %vm1498_vm2, %v1497_v10, %v1315_v38  ;;  %v2839_v62 = vpop.permute.xlu2 %2838 }
 0x192   : > { %v2804_v49 = vpop.permute.xlu1 %2803  ;;  %v2841_v46 = vunpack.i.h.bf16 %v2839_v62  ;;  %v2840_v25 = vunpack.i.l.bf16 %v2839_v62 }
 0x193   : > { %v2806_v7 = vunpack.i.h.bf16 %v2804_v49  ;;  %v2805_v23 = vunpack.i.l.bf16 %v2804_v49 }
 0x195   : > { %v1496_v9 = vsel %vm857_vm0, %v929_v51, %v2806_v7  ;;  %v1495_v54 = vsel %vm857_vm0, %v928_v43, %v2805_v23 }
 0x196   : > { %v1503_v4 = vsel %vm1498_vm2, %v1495_v54, %v2810_v31  ;;  %v1504_v61 = vsel %vm1498_vm2, %v1496_v9, %v2811_v58 }
 0x198   : > { %v2814_v60 = vpop.permute.xlu0 %2813 }
 0x199   : > { %v3696_v55 = vpop.permute.xlu2 %2848  ;;  %v2816_v11 = vunpack.i.h.bf16 %v2814_v60  ;;  %v2815_v45 = vunpack.i.l.bf16 %v2814_v60 }
 0x19a   : > { %v2829_v19 = vpop.permute.xlu1 %2828 }
 0x19b   : > { %v2831_v40 = vunpack.i.h.bf16 %v2829_v19  ;;  %v2830_v34 = vunpack.i.l.bf16 %v2829_v19  ;;  %v1511_v36 = vsel %vm1506_vm3, %v1503_v4, %v2815_v45  ;;  %v1512_v18 = vsel %vm1506_vm3, %v1504_v61, %v2816_v11 }
 0x19d   : > { %v1519_v3 = vsel %vm1514_vm4, %v1511_v36, %v2830_v34  ;;  %v1520_v20 = vsel %vm1514_vm4, %v1512_v18, %v2831_v40  ;;  %v2851_v36 = vunpack.i.h.bf16 %v3696_v55  ;;  %v2850_v18 = vunpack.i.l.bf16 %v3696_v55 }
 0x19e   : > { %v1527_v50 = vsel %vm1522_vm5, %v1519_v3, %v2840_v25  ;;  %v1528_v56 = vsel %vm1522_vm5, %v1520_v20, %v2841_v46 }
 0x1a0   : > { %v3694_v15 = vpop.permute.xlu0 %2818 }
 0x1a1   : > { %v2821_v23 = vunpack.i.h.bf16 %v3694_v15 }
 0x1a2   : > { %v3692_v28 = vpop.permute.xlu1 %1342 }
 0x1a8   : > { %v2824_v44 = vpop.permute.xlu0 %2823 }
 0x1a9   : > { %v2826_v24 = vunpack.i.h.bf16 %v2824_v44  ;;  %v2825_v32 = vunpack.i.l.bf16 %v2824_v44 }
 0x1aa   : > { %v3698_v52 = vpop.permute.xlu1 %2833  ;;  %v3700_v5 = vpop.permute.xlu2 %2858 }
 0x1ab   : > { %v1523_v60 = vsel %vm1522_vm5, %v3668_v2, %v2825_v32  ;;  %v1524_v62 = vsel %vm1522_vm5, %v3671_v12, %v2826_v24  ;;  %v2860_v57 = vunpack.i.l.bf16 %v3700_v5  ;;  %v2820_v2 = vunpack.i.l.bf16 %v3694_v15 }
 0x1ac   : > { %v2836_v12 = vunpack.i.h.bf16 %v3698_v52  ;;  %v2835_v9 = vunpack.i.l.bf16 %v3698_v52  ;;  %v1518_v15 = vsel %vm1514_vm4, %v3683_v39, %v2821_v23  ;;  %v1513_v52 = vsel %vm1506_vm3, %v3688_v41, %v3692_v28 }
 0x1ad   : > { %v1517_v4 = vsel %vm1514_vm4, %v3680_v1, %v2820_v2  ;;  %v1521_v1 = vsel %vm1514_vm4, %v1513_v52, %v3690_v59 }
 0x1ae   : > { %v1525_v61 = vsel %vm1522_vm5, %v1517_v4, %v2835_v9  ;;  %v1526_v40 = vsel %vm1522_vm5, %v1518_v15, %v2836_v12 }
 0x1af   : > { %v1533_v41 = vsel %vm1530_vm6, %v1525_v61, %v2850_v18  ;;  %v1534_v28 = vsel %vm1530_vm6, %v1526_v40, %v2851_v36 }
 0x1b0   : > { %v3702_v17 = vpop.permute.xlu0 %1398 }
 0x1b1   : > { %v1529_v46 = vsel %vm1522_vm5, %v1521_v1, %v3702_v17 }
 0x1b2   : > { %v2844_v47 = vpop.permute.xlu1 %2843  ;;  %v3706_v8 = vpop.permute.xlu2 %1454 }
 0x1b3   : > { %v2846_v14 = vunpack.i.h.bf16 %v2844_v47  ;;  %v2845_v10 = vunpack.i.l.bf16 %v2844_v47  ;;  %v2861_v47 = vunpack.i.h.bf16 %v3700_v5 }
 0x1b5   : > { %v1531_v44 = vsel %vm1530_vm6, %v1523_v60, %v2845_v10  ;;  %v1532_v0 = vsel %vm1530_vm6, %v1524_v62, %v2846_v14 }
 0x1b6   : > { %v1539_v54 = vsel %vm1538_vm7, %v1531_v44, %v2860_v57  ;;  %v1540_v11 = vsel %vm1538_vm7, %v1532_v0, %v2861_v47 }
 0x1b9   : > { %v2854_v37 = vpop.permute.xlu0 %2853 }
 0x1ba   : > { %v3710_v13 = vpop.permute.xlu1 %1426  ;;  %v2856_v63 = vunpack.i.h.bf16 %v2854_v37  ;;  %v2855_v6 = vunpack.i.l.bf16 %v2854_v37  ;;  %v2884_v21 = vpop.permute.xlu2 %2883 }
 0x1bb   : > { %v2886_v48 = vunpack.i.h.bf16 %v2884_v21  ;;  %v2885_v16 = vunpack.i.l.bf16 %v2884_v21  ;;  %v1537_v55 = vsel %vm1530_vm6, %v1529_v46, %v3710_v13 }
 0x1bc   : > { %v1535_v30 = vsel %vm1530_vm6, %v1527_v50, %v2855_v6  ;;  %v1536_v29 = vsel %vm1530_vm6, %v1528_v56, %v2856_v63 }
 0x1ca   : > { %v2864_v26 = vpop.permute.xlu0 %2863 }
 0x1cb   : > { %v2866_v34 = vunpack.i.h.bf16 %v2864_v26  ;;  %v2865_v37 = vunpack.i.l.bf16 %v2864_v26 }
 0x1cd   : > { %v1541_v25 = vsel %vm1538_vm7, %v1533_v41, %v2865_v37  ;;  %v1542_v63 = vsel %vm1538_vm7, %v1534_v28, %v2866_v34 }
 0x1d2   : > { %v2869_v22 = vpop.permute.xlu1 %2868 }
 0x1d3   : > { %v2871_v33 = vunpack.i.h.bf16 %v2869_v22  ;;  %v2870_v27 = vunpack.i.l.bf16 %v2869_v22  ;;  %v1545_v22 = vsel %vm1538_vm7, %v1537_v55, %v3706_v8 }
 0x1d5   : > { %v1543_v42 = vsel %vm1538_vm7, %v1535_v30, %v2870_v27  ;;  %v1544_v35 = vsel %vm1538_vm7, %v1536_v29, %v2871_v33 }
 0x1d6   : > { %v1551_v38 = vsel %vm1546_vm8, %v1543_v42, %v2885_v16  ;;  %v1552_v49 = vsel %vm1546_vm8, %v1544_v35, %v2886_v48 }
 0x1d7   : > { %v1558_v53 = vpack.c.bf16 %v1551_v38, %v1551_v38  ;;  %v1559_v19 = vpack.c.bf16 %v1552_v49, %v1552_v49 }
 0x1d9   : > { %1566 = vst.msk [vmem:[#allocation3 + $0x10] sm:$0xf] %vm1561_vm9, %v1558_v53 }
 0x1da   : > { %1567 = vst.msk [vmem:[#allocation3 + $0x14] sm:$0xf] %vm1561_vm9, %v1559_v19 }
 0x1db   : > { %v2874_v7 = vpop.permute.xlu0 %2873 }
 0x1dc   : > { %v2876_v43 = vunpack.i.h.bf16 %v2874_v7  ;;  %v2875_v51 = vunpack.i.l.bf16 %v2874_v7 }
 0x1de   : > { %v1547_v45 = vsel %vm1546_vm8, %v1539_v54, %v2875_v51  ;;  %v1548_v58 = vsel %vm1546_vm8, %v1540_v11, %v2876_v43 }
 0x1df   : > { %v1554_v5 = vpack.c.bf16 %v1547_v45, %v1547_v45  ;;  %v1555_v31 = vpack.c.bf16 %v1548_v58, %v1548_v58 }
 0x1e1   : > { %1562 = vst.msk [vmem:[#allocation3] sm:$0xf] %vm1561_vm9, %v1554_v5 }
 0x1e2   : > { %1563 = vst.msk [vmem:[#allocation3 + $0x4] sm:$0xf] %vm1561_vm9, %v1555_v31 }
 0x1e3   : > { %v2879_v39 = vpop.permute.xlu1 %2878 }
 0x1e4   : > { %v2881_v3 = vunpack.i.h.bf16 %v2879_v39  ;;  %v2880_v20 = vunpack.i.l.bf16 %v2879_v39 }
 0x1e6   : > { %v1549_v6 = vsel %vm1546_vm8, %v1541_v25, %v2880_v20  ;;  %v1550_v59 = vsel %vm1546_vm8, %v1542_v63, %v2881_v3 }
 0x1e7   : > { %v1556_v21 = vpack.c.bf16 %v1549_v6, %v1549_v6  ;;  %v1557_v50 = vpack.c.bf16 %v1550_v59, %v1550_v59 }
 0x1e9   : > { %1564 = vst.msk [vmem:[#allocation3 + $0x8] sm:$0xf] %vm1561_vm9, %v1556_v21  ;;  %v1483_v56 = vpop.permute.xlu0 %1482 }
 0x1ea   : > { %1565 = vst.msk [vmem:[#allocation3 + $0xc] sm:$0xf] %vm1561_vm9, %v1557_v50  ;;  %v1553_v17 = vsel %vm1546_vm8, %v1545_v22, %v1483_v56 }
 0x1eb   : > { %v1560_v24 = vpack.c.bf16 %v1553_v17, %v1553_v17 }
 0x1ed   : > { %1569 = vst.msk [vmem:[#allocation3 + $0x18] sm:$0x1] %vm1568_vm10, %v1560_v24 }
 0x1ee PF: > { %v1593_v13 = vld [vmem:[%s3245_s14 + $0x80] sm:$0x33]  ;;  %v1594_v26 = vld [vmem:[%s3245_s14 + $0x88] sm:$0x33]  ;;  %vm1746_vm11 = vcmask 1041408   ;;  %vm1733_vm12 = vcmask 293888  }
 0x1ef   : > { %v1685_v8 = vunpack.c.l.b16 %v1593_v13  ;;  %v1686_v33 = vunpack.c.h.b16 %v1593_v13  ;;  %v1687_v27 = vunpack.c.l.b16 %v1594_v26  ;;  %v1688_v30 = vunpack.c.h.b16 %v1594_v26  ;;  %v2502_v29 = vld [vmem:[%s3245_s14 + $0x40] sm:$0xf]  ;;  %v2624_v14 = vld [vmem:[%s3245_s14 + $0x44] sm:$0xf]  ;;  %v2510_v38 = vld [vmem:[%s3245_s14 + $0x48] sm:$0xf] }
 0x1f0   : > { %v2628_v48 = vld [vmem:[%s3245_s14 + $0x5c] sm:$0xf0]  ;;  %v2504_v10 = vld [vmem:[%s3245_s14 + $0x60] sm:$0xf0]  ;;  %v2629_v49 = vld [vmem:[%s3245_s14 + $0x64] sm:$0xf0] }
 0x1f1   : > { %v1709_v16 = vpack.c.b16 %v1685_v8, %v1685_v8  ;;  %v1710_v32 = vpack.c.b16 %v1686_v33, %v1686_v33  ;;  %v1711_v42 = vpack.c.b16 %v1687_v27, %v1687_v27  ;;  %v1712_v35 = vpack.c.b16 %v1688_v30, %v1688_v30  ;;  %v2625_v53 = vld [vmem:[%s3245_s14 + $0x4c] sm:$0xf]  ;;  %v2470_v47 = vld [vmem:[%s3245_s14] sm:$0xf]  ;;  %v2616_v2 = vld [vmem:[%s3245_s14 + $0x4] sm:$0xf] }
 0x1f2   : > { %v2512_v19 = vld [vmem:[%s3245_s14 + $0x68] sm:$0xf0]  ;;  %v2503_v57 = vor.u32 %v2628_v48, %v2502_v29  ;;  %v2507_v7 = vor.u32 %v2624_v14, %v2504_v10  ;;  %v2620_v23 = vld [vmem:[%s3245_s14 + $0x1c] sm:$0xf0]  ;;  %v2472_v43 = vld [vmem:[%s3245_s14 + $0x20] sm:$0xf0]  ;;  %v2511_v51 = vor.u32 %v2629_v49, %v2510_v38 }
 0x1f3   : > { %v1748_v60 = vsel %vm1746_vm11, %v1709_v16, 0  ;;  %v1751_v62 = vsel %vm1746_vm11, %v1710_v32, 0  ;;  %v1754_v44 = vsel %vm1746_vm11, %v1711_v42, 0  ;;  %v1757_v0 = vsel %vm1746_vm11, %v1712_v35, 0  ;;  %v2478_v9 = vld [vmem:[%s3245_s14 + $0x8] sm:$0xf] }
 0x1f4   : > { %1776 = vmatpush.bf16.msra.mxu0 %v1748_v60  ;;  %1804 = vmatpush.bf16.msra.mxu1 %v1751_v62  ;;  %v2515_v12 = vor.u32 %v2625_v53, %v2512_v19  ;;  %v1596_v54 = vld [vmem:[%s3245_s14 + $0x98] sm:$0x33]  ;;  %v1595_v11 = vld [vmem:[%s3245_s14 + $0x90] sm:$0x33]  ;;  %v2621_v45 = vld [vmem:[%s3245_s14 + $0x24] sm:$0xf0]  ;;  %v2471_v61 = vor.u32 %v2620_v23, %v2470_v47  ;;  %v2475_v40 = vor.u32 %v2616_v2, %v2472_v43 }
 0x1f5   : > { %1832 = vmatpush.bf16.msra.mxu2 %v1754_v44  ;;  %1860 = vmatpush.bf16.msra.mxu3 %v1757_v0  ;;  %v2617_v58 = vld [vmem:[%s3245_s14 + $0xc] sm:$0xf]  ;;  %v1691_v31 = vunpack.c.l.b16 %v1596_v54  ;;  %v1692_v4 = vunpack.c.h.b16 %v1596_v54  ;;  %v1689_v15 = vunpack.c.l.b16 %v1595_v11  ;;  %v1690_v52 = vunpack.c.h.b16 %v1595_v11  ;;  %v2526_v28 = vld [vmem:[%s3245_s14 + $0x58] sm:$0xf]  ;;  %v2627_v25 = vld [vmem:[%s3245_s14 + $0x5c] sm:$0xf] }
 0x1f6   : > { %v2480_v5 = vld [vmem:[%s3245_s14 + $0x28] sm:$0xf0]  ;;  %v2479_v36 = vor.u32 %v2621_v45, %v2478_v9  ;;  %v2631_v3 = vld [vmem:[%s3245_s14 + $0x74] sm:$0xf0]  ;;  %v2528_v63 = vld [vmem:[%s3245_s14 + $0x78] sm:$0xf0] }
 0x1f7   : > { %v1715_v34 = vpack.c.b16 %v1691_v31, %v1691_v31  ;;  %v1716_v37 = vpack.c.b16 %v1692_v4, %v1692_v4  ;;  %v2483_v18 = vor.u32 %v2617_v58, %v2480_v5  ;;  %v3798_v1 = vld [vmem:[#allocation3] sm:$0xff]  ;;  %v1713_v39 = vpack.c.b16 %v1689_v15, %v1689_v15  ;;  %v2626_v22 = vld [vmem:[%s3245_s14 + $0x54] sm:$0xf]  ;;  %v2494_v24 = vld [vmem:[%s3245_s14 + $0x18] sm:$0xf]  ;;  %s4081_s27 = sld [smem:[#allocation21_spill]] (%p3185_p10) }
 0x1f8   : > { %1777 = vmatpush.bf16.msra.mxu0 %v2503_v57  ;;  %1805 = vmatpush.bf16.msra.mxu1 %v2507_v7  ;;  %v1714_v41 = vpack.c.b16 %v1690_v52, %v1690_v52  ;;  %v2518_v55 = vld [vmem:[%s3245_s14 + $0x50] sm:$0xf]  ;;  %v2527_v50 = vor.u32 %v2631_v3, %v2526_v28  ;;  %v2531_v56 = vor.u32 %v2627_v25, %v2528_v63  ;;  %v2520_v17 = vld [vmem:[%s3245_s14 + $0x70] sm:$0xf0]  ;;  %v2623_v13 = vld [vmem:[%s3245_s14 + $0x34] sm:$0xf0] }
 0x1f9   : > { %1833 = vmatpush.bf16.msra.mxu2 %v2511_v51  ;;  %1861 = vmatpush.bf16.msra.mxu3 %v2515_v12  ;;  %v1766_v20 = vsel %vm1746_vm11, %v1715_v34, 0  ;;  %v1769_v46 = vsel %vm1746_vm11, %v1716_v37, 0  ;;  %v2630_v6 = vld [vmem:[%s3245_s14 + $0x6c] sm:$0xf0]  ;;  %v1760_v59 = vsel %vm1746_vm11, %v1713_v39, 0  ;;  %v2523_v33 = vor.u32 %v2626_v22, %v2520_v17  ;;  %v2615_v38 = vld [vmem:[#allocation3 + $0x10] sm:$0xff] }
 0x1fa   : > { %v1763_v21 = vsel %vm1746_vm11, %v1714_v41, 0  ;;  %v2619_v26 = vld [vmem:[%s3245_s14 + $0x1c] sm:$0xf]  ;;  %v2519_v8 = vor.u32 %v2630_v6, %v2518_v55  ;;  %v2495_v30 = vor.u32 %v2623_v13, %v2494_v24  ;;  %v2614_v48 = vld [vmem:[#allocation3 + $0x8] sm:$0xff]  ;;  %v1576_v49 = vld [vmem:[#allocation3 + $0x18] sm:$0x1] }
 0x1fb   : > { %v2496_v27 = vld [vmem:[%s3245_s14 + $0x38] sm:$0xf0]  ;;  %v2486_v16 = vld [vmem:[%s3245_s14 + $0x10] sm:$0xf]  ;;  %v2618_v42 = vld [vmem:[%s3245_s14 + $0x14] sm:$0xf]  ;;  %v1628_v53 = vunpack.c.l.b16 %v1576_v49 }
 0x1fc   : > { %1778 = vmatpush.bf16.msra.mxu0 %v2471_v61  ;;  %1806 = vmatpush.bf16.msra.mxu1 %v2475_v40  ;;  %v2499_v29 = vor.u32 %v2619_v26, %v2496_v27  ;;  %v2622_v32 = vld [vmem:[%s3245_s14 + $0x2c] sm:$0xf0]  ;;  %v2488_v14 = vld [vmem:[%s3245_s14 + $0x30] sm:$0xf0]  ;;  %v3861_v60 = vld [vmem:[%s3251_s20] sm:$0xff]  ;;  %s2632_s20 = sshll.u32 (%p3185_p10), %s3058_s24, 5 }
 0x1fd   : > { %1834 = vmatpush.bf16.msra.mxu2 %v2479_v36  ;;  %1862 = vmatpush.bf16.msra.mxu3 %v2483_v18  ;;  %v2487_v35 = vor.u32 %v2622_v32, %v2486_v16  ;;  %v2491_v10 = vor.u32 %v2618_v42, %v2488_v14  ;;  %v1632_v19 = vpack.c.b16 %v1628_v53, %v1628_v53  ;;  %v3864_v62 = vperm.slane %v3861_v60, 0  ;;  %s3979_s8 = scalar_lea.vmem (%p3185_p10), %s4081_s27, %s2632_s20 }
 0x1fe   : > { %v3867_v44 = vperm.slane %v3861_v60, 1  ;;  %v3872_v2 = vperm.slane %v3861_v60, 2  ;;  %v3875_v43 = vperm.slane %v3861_v60, 3 }
 0x1ff   : > { %2532 = vmatmul.msk.bf16.vlgmr.msra.gmra.mxu0 %vm1733_vm12, %v3798_v1  ;;  %2536 = vmatmul.msk.bf16.vlgmr.msra.gmra.mxu1 %vm1733_vm12, %v3798_v1 }
 0x200   : > { %2540 = vmatmul.msk.bf16.vlgmr.msra.gmra.mxu2 %vm1733_vm12, %v3798_v1  ;;  %2544 = vmatmul.msk.bf16.vlgmr.msra.gmra.mxu3 %vm1733_vm12, %v3798_v1 }
 0x201   : > { %1944 = vmatpush.bf16.msrb.mxu2 %v1766_v20  ;;  %1972 = vmatpush.bf16.msrb.mxu3 %v1769_v46 }
 0x202   : > { %1888 = vmatpush.bf16.msrb.mxu0 %v1760_v59  ;;  %1916 = vmatpush.bf16.msrb.mxu1 %v1763_v21 }
 0x205   : > { %1945 = vmatpush.bf16.msrb.mxu2 %v2527_v50  ;;  %1973 = vmatpush.bf16.msrb.mxu3 %v2531_v56 }
 0x206   : > { %1889 = vmatpush.bf16.msrb.mxu0 %v2519_v8  ;;  %1917 = vmatpush.bf16.msrb.mxu1 %v2523_v33 }
 0x209   : > { %1946 = vmatpush.bf16.msrb.mxu2 %v2495_v30  ;;  %1974 = vmatpush.bf16.msrb.mxu3 %v2499_v29 }
 0x20a   : > { %1890 = vmatpush.bf16.msrb.mxu0 %v2487_v35  ;;  %1918 = vmatpush.bf16.msrb.mxu1 %v2491_v10 }
 0x20f   : > { %2533 = vmatmul.msk.bf16.gmra.mxu0 %vm1733_vm12, %v2614_v48  ;;  %2537 = vmatmul.msk.bf16.gmra.mxu1 %vm1733_vm12, %v2614_v48 }
 0x210   : > { %2541 = vmatmul.msk.bf16.gmra.mxu2 %vm1733_vm12, %v2614_v48  ;;  %2545 = vmatmul.msk.bf16.gmra.mxu3 %vm1733_vm12, %v2614_v48 }
 0x21f   : > { %2534 = vmatmul.msk.bf16.gmra.mxu0 %vm1733_vm12, %v2615_v38  ;;  %2538 = vmatmul.msk.bf16.gmra.mxu1 %vm1733_vm12, %v2615_v38 }
 0x220   : > { %2542 = vmatmul.msk.bf16.gmra.mxu2 %vm1733_vm12, %v2615_v38  ;;  %2546 = vmatmul.msk.bf16.gmra.mxu3 %vm1733_vm12, %v2615_v38 }
 0x22f   : > { %2535 = vmatmul.msk.bf16.gmra.mxu0 %vm1733_vm12, %v1632_v19  ;;  %2539 = vmatmul.msk.bf16.gmra.mxu1 %vm1733_vm12, %v1632_v19 }
 0x230   : > { %2543 = vmatmul.msk.bf16.gmra.mxu2 %vm1733_vm12, %v1632_v19  ;;  %2547 = vmatmul.msk.bf16.gmra.mxu3 %vm1733_vm12, %v1632_v19 }
 0x23f   : > { %2548 = vmatmul.msk.bf16.vlgmr.msrb.gmra.mxu0 %vm1733_vm12, %v3798_v1  ;;  %2552 = vmatmul.msk.bf16.vlgmr.msrb.gmra.mxu1 %vm1733_vm12, %v3798_v1 }
 0x240   : > { %2556 = vmatmul.msk.bf16.vlgmr.msrb.gmra.mxu2 %vm1733_vm12, %v3798_v1  ;;  %2560 = vmatmul.msk.bf16.vlgmr.msrb.gmra.mxu3 %vm1733_vm12, %v3798_v1 }
 0x24f   : > { %2549 = vmatmul.msk.bf16.gmra.mxu0 %vm1733_vm12, %v2614_v48  ;;  %2553 = vmatmul.msk.bf16.gmra.mxu1 %vm1733_vm12, %v2614_v48 }
 0x250   : > { %2557 = vmatmul.msk.bf16.gmra.mxu2 %vm1733_vm12, %v2614_v48  ;;  %2561 = vmatmul.msk.bf16.gmra.mxu3 %vm1733_vm12, %v2614_v48 }
 0x25f   : > { %2550 = vmatmul.msk.bf16.gmra.mxu0 %vm1733_vm12, %v2615_v38  ;;  %2554 = vmatmul.msk.bf16.gmra.mxu1 %vm1733_vm12, %v2615_v38 }
 0x260   : > { %2558 = vmatmul.msk.bf16.gmra.mxu2 %vm1733_vm12, %v2615_v38  ;;  %2562 = vmatmul.msk.bf16.gmra.mxu3 %vm1733_vm12, %v2615_v38 }
 0x26f   : > { %2551 = vmatmul.msk.bf16.gmra.mxu0 %vm1733_vm12, %v1632_v19  ;;  %2555 = vmatmul.msk.bf16.gmra.mxu1 %vm1733_vm12, %v1632_v19 }
 0x270   : > { %2559 = vmatmul.msk.bf16.gmra.mxu2 %vm1733_vm12, %v1632_v19  ;;  %2563 = vmatmul.msk.bf16.gmra.mxu3 %vm1733_vm12, %v1632_v19 }
 0x27c   : > { %v1780_v0 = vpop.f32.mrf.mxu0  ;;  %v1808_v47 = vpop.f32.mrf.mxu1 }
 0x27d   : > { %v1781_v57 = vadd.f32 %v1780_v0, %v3864_v62  ;;  %v1809_v7 = vadd.f32 %v1808_v47, %v3867_v44 }
 0x27f   : > { %v1995_v23 = vpack.c.bf16 %v1809_v7, %v1781_v57 }
 0x281   : > { %2023 = vst [vmem:[%s3253_s15] sm:$0xff] %v1995_v23 }
 0x283   : > { %v1836_v51 = vpop.f32.mrf.mxu2  ;;  %v1864_v12 = vpop.f32.mrf.mxu3 }
 0x284   : > { %v1837_v9 = vadd.f32 %v1836_v51, %v3872_v2  ;;  %v1865_v54 = vadd.f32 %v1864_v12, %v3875_v43  ;;  %v1782_v11 = vpop.f32.mrf.mxu0  ;;  %v1810_v45 = vpop.f32.mrf.mxu1 }
 0x285   : > { %v1783_v58 = vadd.f32 %v1782_v11, %v3864_v62  ;;  %v1811_v5 = vadd.f32 %v1810_v45, %v3867_v44 }
 0x286   : > { %v1996_v31 = vpack.c.bf16 %v1865_v54, %v1837_v9 }
 0x287   : > { %v1999_v4 = vpack.c.bf16 %v1811_v5, %v1783_v58 }
 0x288   : > { %2024 = vst [vmem:[%s3253_s15 + $0x8] sm:$0xff] %v1996_v31  ;;  %v3918_v31 = vperm.slane %v3861_v60, 4 }
 0x289   : > { %2027 = vst [vmem:[%s3253_s15 + $0x20] sm:$0xff] %v1999_v4 }
 0x28b   : > { %v1838_v15 = vpop.f32.mrf.mxu2  ;;  %v1866_v52 = vpop.f32.mrf.mxu3 }
 0x28c   : > { %v1839_v61 = vadd.f32 %v1838_v15, %v3872_v2  ;;  %v1867_v40 = vadd.f32 %v1866_v52, %v3875_v43  ;;  %v1785_v34 = vpop.f32.mrf.mxu0  ;;  %v1813_v37 = vpop.f32.mrf.mxu1 }
 0x28d   : > { %v1786_v36 = vadd.f32 %v1785_v34, %v3864_v62  ;;  %v1814_v18 = vadd.f32 %v1813_v37, %v3867_v44  ;;  %v3929_v34 = vperm.slane %v3861_v60, 7 }
 0x28e   : > { %v2000_v1 = vpack.c.bf16 %v1867_v40, %v1839_v61  ;;  %v3926_v40 = vperm.slane %v3861_v60, 6 }
 0x28f   : > { %v2003_v39 = vpack.c.bf16 %v1814_v18, %v1786_v36 }
 0x290   : > { %2028 = vst [vmem:[%s3253_s15 + $0x28] sm:$0xff] %v2000_v1 }
 0x291   : > { %2031 = vst [vmem:[%s3253_s15 + $0x40] sm:$0xff] %v2003_v39 }
 0x293   : > { %v1841_v41 = vpop.f32.mrf.mxu2  ;;  %v1869_v28 = vpop.f32.mrf.mxu3 }
 0x294   : > { %v1842_v3 = vadd.f32 %v1841_v41, %v3872_v2  ;;  %v1870_v20 = vadd.f32 %v1869_v28, %v3875_v43  ;;  %v1787_v46 = vpop.f32.mrf.mxu0  ;;  %v1815_v25 = vpop.f32.mrf.mxu1 }
 0x295   : > { %v1788_v63 = vadd.f32 %v1787_v46, %v3864_v62  ;;  %v1816_v55 = vadd.f32 %v1815_v25, %v3867_v44 }
 0x296   : > { %v2004_v6 = vpack.c.bf16 %v1870_v20, %v1842_v3 }
 0x297   : > { %v2007_v59 = vpack.c.bf16 %v1816_v55, %v1788_v63 }
 0x298   : > { %2032 = vst [vmem:[%s3253_s15 + $0x48] sm:$0xff] %v2004_v6 }
 0x299   : > { %2035 = vst [vmem:[%s3253_s15 + $0x60] sm:$0xff] %v2007_v59 }
 0x29b   : > { %v1843_v21 = vpop.f32.mrf.mxu2  ;;  %v1871_v50 = vpop.f32.mrf.mxu3 }
 0x29c   : > { %v1844_v56 = vadd.f32 %v1843_v21, %v3872_v2  ;;  %v1872_v22 = vadd.f32 %v1871_v50, %v3875_v43  ;;  %v1790_v17 = vpop.f32.mrf.mxu0  ;;  %v1818_v24 = vpop.f32.mrf.mxu1 }
 0x29d   : > { %v1791_v13 = vadd.f32 %v1790_v17, %v3864_v62  ;;  %v1819_v26 = vadd.f32 %v1818_v24, %v3867_v44 }
 0x29e   : > { %v2008_v8 = vpack.c.bf16 %v1872_v22, %v1844_v56 }
 0x29f   : > { %v2011_v33 = vpack.c.bf16 %v1819_v26, %v1791_v13 }
 0x2a0   : > { %2036 = vst [vmem:[%s3253_s15 + $0x68] sm:$0xff] %v2008_v8 }
 0x2a1   : > { %2039 = vst [vmem:[%s3253_s15 + $0x80] sm:$0xff] %v2011_v33 }
 0x2a3   : > { %v1846_v27 = vpop.f32.mrf.mxu2  ;;  %v1874_v30 = vpop.f32.mrf.mxu3 }
 0x2a4   : > { %v1847_v29 = vadd.f32 %v1846_v27, %v3872_v2  ;;  %v1875_v48 = vadd.f32 %v1874_v30, %v3875_v43  ;;  %v1792_v16 = vpop.f32.mrf.mxu0  ;;  %v1820_v32 = vpop.f32.mrf.mxu1 }
 0x2a5   : > { %v1793_v42 = vadd.f32 %v1792_v16, %v3864_v62  ;;  %v1821_v35 = vadd.f32 %v1820_v32, %v3867_v44 }
 0x2a6   : > { %v2012_v14 = vpack.c.bf16 %v1875_v48, %v1847_v29 }
 0x2a7   : > { %v2015_v10 = vpack.c.bf16 %v1821_v35, %v1793_v42 }
 0x2a8   : > { %2040 = vst [vmem:[%s3253_s15 + $0x88] sm:$0xff] %v2012_v14 }
 0x2a9   : > { %2043 = vst [vmem:[%s3253_s15 + $0xa0] sm:$0xff] %v2015_v10 }
 0x2ab   : > { %v1848_v38 = vpop.f32.mrf.mxu2  ;;  %v1876_v49 = vpop.f32.mrf.mxu3 }
 0x2ac   : > { %v1849_v53 = vadd.f32 %v1848_v38, %v3872_v2  ;;  %v1877_v19 = vadd.f32 %v1876_v49, %v3875_v43  ;;  %v1795_v0 = vpop.f32.mrf.mxu0  ;;  %v1823_v47 = vpop.f32.mrf.mxu1 }
 0x2ad   : > { %v1796_v57 = vadd.f32 %v1795_v0, %v3864_v62  ;;  %v1824_v7 = vadd.f32 %v1823_v47, %v3867_v44  ;;  %v3921_v62 = vperm.slane %v3861_v60, 5 }
 0x2ae   : > { %v2016_v23 = vpack.c.bf16 %v1877_v19, %v1849_v53 }
 0x2af   : > { %v2019_v51 = vpack.c.bf16 %v1824_v7, %v1796_v57 }
 0x2b0   : > { %2044 = vst [vmem:[%s3253_s15 + $0xa8] sm:$0xff] %v2016_v23 }
 0x2b1   : > { %2047 = vst [vmem:[%s3253_s15 + $0xc0] sm:$0x11] %v2019_v51 }
 0x2b3   : > { %v1851_v12 = vpop.f32.mrf.mxu2  ;;  %v1879_v9 = vpop.f32.mrf.mxu3 }
 0x2b4   : > { %v1852_v54 = vadd.f32 %v1851_v12, %v3872_v2  ;;  %v1880_v11 = vadd.f32 %v1879_v9, %v3875_v43  ;;  %v1797_v45 = vpop.f32.mrf.mxu0  ;;  %v1825_v58 = vpop.f32.mrf.mxu1 }
 0x2b6   : > { %v2020_v5 = vpack.c.bf16 %v1880_v11, %v1852_v54 }
 0x2b8   : > { %2048 = vst [vmem:[%s3253_s15 + $0xc8] sm:$0x11] %v2020_v5 }
 0x2bb   : > { %v1853_v44 = vpop.f32.mrf.mxu2  ;;  %v1881_v4 = vpop.f32.mrf.mxu3 }
 0x2bc   : > { %v1892_v15 = vpop.f32.mrf.mxu0  ;;  %v1920_v52 = vpop.f32.mrf.mxu1 }
 0x2bd   : > { %v1893_v61 = vadd.f32 %v1892_v15, %v3918_v31  ;;  %v1921_v2 = vadd.f32 %v1920_v52, %v3921_v62 }
 0x2bf   : > { %v1997_v43 = vpack.c.bf16 %v1921_v2, %v1893_v61 }
 0x2c1   : > { %2025 = vst [vmem:[%s3253_s15 + $0x10] sm:$0xff] %v1997_v43 }
 0x2c3   : > { %v1948_v37 = vpop.f32.mrf.mxu2  ;;  %v1976_v36 = vpop.f32.mrf.mxu3 }
 0x2c4   : > { %v1949_v18 = vadd.f32 %v1948_v37, %v3926_v40  ;;  %v1977_v1 = vadd.f32 %v1976_v36, %v3929_v34  ;;  %v1894_v39 = vpop.f32.mrf.mxu0  ;;  %v1922_v41 = vpop.f32.mrf.mxu1 }
 0x2c5   : > { %v1895_v28 = vadd.f32 %v1894_v39, %v3918_v31  ;;  %v1923_v3 = vadd.f32 %v1922_v41, %v3921_v62 }
 0x2c6   : > { %v1998_v20 = vpack.c.bf16 %v1977_v1, %v1949_v18 }
 0x2c7   : > { %v2001_v46 = vpack.c.bf16 %v1923_v3, %v1895_v28 }
 0x2c8   : > { %2026 = vst [vmem:[%s3253_s15 + $0x18] sm:$0xff] %v1998_v20 }
 0x2c9   : > { %2029 = vst [vmem:[%s3253_s15 + $0x30] sm:$0xff] %v2001_v46  ;;  %v2084_v46 = vld [vmem:[%s3253_s15 + $0x20] sm:$0xff] (%p3185_p10) }
 0x2ca   : > { %2085 = vst [vmem:[%s3979_s8 + $0x80] sm:$0xff] (%p3185_p10), %v2084_v46 }
 0x2cb   : > { %v1950_v60 = vpop.f32.mrf.mxu2  ;;  %v1978_v25 = vpop.f32.mrf.mxu3 }
 0x2cc   : > { %v1951_v63 = vadd.f32 %v1950_v60, %v3926_v40  ;;  %v1979_v55 = vadd.f32 %v1978_v25, %v3929_v34  ;;  %v1897_v6 = vpop.f32.mrf.mxu0  ;;  %v1925_v59 = vpop.f32.mrf.mxu1  ;;  %v2086_v60 = vld [vmem:[%s3253_s15 + $0x28] sm:$0xff] (%p3185_p10) }
 0x2cd   : > { %v1898_v21 = vadd.f32 %v1897_v6, %v3918_v31  ;;  %v1926_v50 = vadd.f32 %v1925_v59, %v3921_v62  ;;  %2087 = vst [vmem:[%s3979_s8 + $0x88] sm:$0xff] (%p3185_p10), %v2086_v60  ;;  %v2094_v6 = vld [vmem:[%s3253_s15 + $0x48] sm:$0xff] (%p3185_p10) }
 0x2ce   : > { %v2002_v56 = vpack.c.bf16 %v1979_v55, %v1951_v63  ;;  %v2092_v55 = vld [vmem:[%s3253_s15 + $0x40] sm:$0xff] (%p3185_p10)  ;;  %2095 = vst [vmem:[%s3979_s8 + $0x108] sm:$0xff] (%p3185_p10), %v2094_v6 }
 0x2cf   : > { %v2005_v22 = vpack.c.bf16 %v1926_v50, %v1898_v21  ;;  %2093 = vst [vmem:[%s3979_s8 + $0x100] sm:$0xff] (%p3185_p10), %v2092_v55  ;;  %v2100_v50 = vld [vmem:[%s3253_s15 + $0x60] sm:$0xff] (%p3185_p10) }
 0x2d0   : > { %2030 = vst [vmem:[%s3253_s15 + $0x38] sm:$0xff] %v2002_v56  ;;  %v2088_v25 = vld [vmem:[%s3253_s15 + $0x30] sm:$0xff] (%p3185_p10)  ;;  %v2102_v56 = vld [vmem:[%s3253_s15 + $0x68] sm:$0xff] (%p3185_p10) }
 0x2d1   : > { %2033 = vst [vmem:[%s3253_s15 + $0x50] sm:$0xff] %v2005_v22 }
 0x2d2   : > { %2089 = vst [vmem:[%s3979_s8 + $0x90] sm:$0xff] (%p3185_p10), %v2088_v25 }
 0x2d3   : > { %v1953_v17 = vpop.f32.mrf.mxu2  ;;  %v1981_v24 = vpop.f32.mrf.mxu3  ;;  %2101 = vst [vmem:[%s3979_s8 + $0x180] sm:$0xff] (%p3185_p10), %v2100_v50 }
 0x2d4   : > { %v1954_v13 = vadd.f32 %v1953_v17, %v3926_v40  ;;  %v1982_v26 = vadd.f32 %v1981_v24, %v3929_v34  ;;  %v1899_v8 = vpop.f32.mrf.mxu0  ;;  %v1927_v33 = vpop.f32.mrf.mxu1  ;;  %2103 = vst [vmem:[%s3979_s8 + $0x188] sm:$0xff] (%p3185_p10), %v2102_v56  ;;  %v2108_v24 = vld [vmem:[%s3253_s15 + $0x80] sm:$0xff] (%p3185_p10) }
 0x2d5   : > { %v1900_v27 = vadd.f32 %v1899_v8, %v3918_v31  ;;  %v1928_v30 = vadd.f32 %v1927_v33, %v3921_v62  ;;  %2109 = vst [vmem:[%s3979_s8 + $0x200] sm:$0xff] (%p3185_p10), %v2108_v24  ;;  %v2116_v33 = vld [vmem:[%s3253_s15 + $0xa0] sm:$0xff] (%p3185_p10) }
 0x2d6   : > { %v2006_v29 = vpack.c.bf16 %v1982_v26, %v1954_v13  ;;  %v2110_v13 = vld [vmem:[%s3253_s15 + $0x88] sm:$0xff] (%p3185_p10)  ;;  %2117 = vst [vmem:[%s3979_s8 + $0x280] sm:$0xff] (%p3185_p10), %v2116_v33 }
 0x2d7   : > { %v2009_v48 = vpack.c.bf16 %v1928_v30, %v1900_v27  ;;  %v2090_v63 = vld [vmem:[%s3253_s15 + $0x38] sm:$0xff] (%p3185_p10)  ;;  %2111 = vst [vmem:[%s3979_s8 + $0x208] sm:$0xff] (%p3185_p10), %v2110_v13  ;;  %v2118_v27 = vld [vmem:[%s3253_s15 + $0xa8] sm:$0xff] (%p3185_p10) }
 0x2d8   : > { %2034 = vst [vmem:[%s3253_s15 + $0x58] sm:$0xff] %v2006_v29  ;;  %v2096_v59 = vld [vmem:[%s3253_s15 + $0x50] sm:$0xff] (%p3185_p10) }
 0x2d9   : > { %2037 = vst [vmem:[%s3253_s15 + $0x70] sm:$0xff] %v2009_v48  ;;  %v2124_v48 = vld [vmem:[%s3253_s15 + $0xc0] sm:$0xff] (%p3185_p10) }
 0x2da   : > { %2091 = vst [vmem:[%s3979_s8 + $0x98] sm:$0xff] (%p3185_p10), %v2090_v63 }
 0x2db   : > { %v1955_v16 = vpop.f32.mrf.mxu2  ;;  %v1983_v32 = vpop.f32.mrf.mxu3  ;;  %2097 = vst [vmem:[%s3979_s8 + $0x110] sm:$0xff] (%p3185_p10), %v2096_v59 }
 0x2dc   : > { %v1956_v42 = vadd.f32 %v1955_v16, %v3926_v40  ;;  %v1984_v35 = vadd.f32 %v1983_v32, %v3929_v34  ;;  %v1902_v14 = vpop.f32.mrf.mxu0  ;;  %v1930_v10 = vpop.f32.mrf.mxu1  ;;  %2119 = vst [vmem:[%s3979_s8 + $0x288] sm:$0xff] (%p3185_p10), %v2118_v27  ;;  %v2126_v16 = vld [vmem:[%s3253_s15 + $0xc8] sm:$0xff] (%p3185_p10) }
 0x2dd   : > { %v1903_v38 = vadd.f32 %v1902_v14, %v3918_v31  ;;  %v1931_v49 = vadd.f32 %v1930_v10, %v3921_v62  ;;  %2125 = vst [vmem:[%s3979_s8 + $0x300] sm:$0xff] (%p3185_p10), %v2124_v48 }
 0x2de   : > { %v2010_v53 = vpack.c.bf16 %v1984_v35, %v1956_v42  ;;  %2127 = vst [vmem:[%s3979_s8 + $0x308] sm:$0xff] (%p3185_p10), %v2126_v16 }
 0x2df   : > { %v2013_v19 = vpack.c.bf16 %v1931_v49, %v1903_v38  ;;  %v2098_v21 = vld [vmem:[%s3253_s15 + $0x58] sm:$0xff] (%p3185_p10) }
 0x2e0   : > { %2038 = vst [vmem:[%s3253_s15 + $0x78] sm:$0xff] %v2010_v53  ;;  %v2104_v22 = vld [vmem:[%s3253_s15 + $0x70] sm:$0xff] (%p3185_p10) }
 0x2e1   : > { %2041 = vst [vmem:[%s3253_s15 + $0x90] sm:$0xff] %v2013_v19 }
 0x2e2   : > { %2099 = vst [vmem:[%s3979_s8 + $0x118] sm:$0xff] (%p3185_p10), %v2098_v21 }
 0x2e3   : > { %v1958_v0 = vpop.f32.mrf.mxu2  ;;  %v1986_v47 = vpop.f32.mrf.mxu3  ;;  %2105 = vst [vmem:[%s3979_s8 + $0x190] sm:$0xff] (%p3185_p10), %v2104_v22 }
 0x2e4   : > { %v1959_v57 = vadd.f32 %v1958_v0, %v3926_v40  ;;  %v1987_v7 = vadd.f32 %v1986_v47, %v3929_v34  ;;  %v1904_v23 = vpop.f32.mrf.mxu0  ;;  %v1932_v51 = vpop.f32.mrf.mxu1 }
 0x2e5   : > { %v1905_v12 = vadd.f32 %v1904_v23, %v3918_v31  ;;  %v1933_v9 = vadd.f32 %v1932_v51, %v3921_v62 }
 0x2e6   : > { %v2014_v54 = vpack.c.bf16 %v1987_v7, %v1959_v57 }
 0x2e7   : > { %v2017_v11 = vpack.c.bf16 %v1933_v9, %v1905_v12  ;;  %v2106_v17 = vld [vmem:[%s3253_s15 + $0x78] sm:$0xff] (%p3185_p10) }
 0x2e8   : > { %2042 = vst [vmem:[%s3253_s15 + $0x98] sm:$0xff] %v2014_v54  ;;  %v2112_v26 = vld [vmem:[%s3253_s15 + $0x90] sm:$0xff] (%p3185_p10) }
 0x2e9   : > { %2045 = vst [vmem:[%s3253_s15 + $0xb0] sm:$0xff] %v2017_v11 }
 0x2ea   : > { %2107 = vst [vmem:[%s3979_s8 + $0x198] sm:$0xff] (%p3185_p10), %v2106_v17 }
 0x2eb   : > { %v1960_v45 = vpop.f32.mrf.mxu2  ;;  %v1988_v58 = vpop.f32.mrf.mxu3  ;;  %2113 = vst [vmem:[%s3979_s8 + $0x210] sm:$0xff] (%p3185_p10), %v2112_v26 }
 0x2ec   : > { %v1961_v5 = vadd.f32 %v1960_v45, %v3926_v40  ;;  %v1989_v44 = vadd.f32 %v1988_v58, %v3929_v34  ;;  %v1907_v4 = vpop.f32.mrf.mxu0  ;;  %v1935_v15 = vpop.f32.mrf.mxu1 }
 0x2ed   : > { %v1908_v52 = vadd.f32 %v1907_v4, %v3918_v31  ;;  %v1936_v61 = vadd.f32 %v1935_v15, %v3921_v62  ;;  %v2076_v31 = vld [vmem:[%s3253_s15] sm:$0xff] (%p3185_p10)  ;;  %v2078_v62 = vld [vmem:[%s3253_s15 + $0x8] sm:$0xff] (%p3185_p10) }
 0x2ee   : > { %v2018_v2 = vpack.c.bf16 %v1989_v44, %v1961_v5  ;;  %2077 = vst [vmem:[%s3979_s8] sm:$0xff] (%p3185_p10), %v2076_v31 }
 0x2ef   : > { %v2021_v43 = vpack.c.bf16 %v1936_v61, %v1908_v52  ;;  %2079 = vst [vmem:[%s3979_s8 + $0x8] sm:$0xff] (%p3185_p10), %v2078_v62  ;;  %v2114_v8 = vld [vmem:[%s3253_s15 + $0x98] sm:$0xff] (%p3185_p10) }
 0x2f0   : > { %2046 = vst [vmem:[%s3253_s15 + $0xb8] sm:$0xff] %v2018_v2  ;;  %v2120_v30 = vld [vmem:[%s3253_s15 + $0xb0] sm:$0xff] (%p3185_p10) }
 0x2f1   : > { %2049 = vst [vmem:[%s3253_s15 + $0xd0] sm:$0x11] %v2021_v43 }
 0x2f2   : > { %2115 = vst [vmem:[%s3979_s8 + $0x218] sm:$0xff] (%p3185_p10), %v2114_v8 }
 0x2f3   : > { %v1963_v37 = vpop.f32.mrf.mxu2  ;;  %v1991_v36 = vpop.f32.mrf.mxu3  ;;  %2121 = vst [vmem:[%s3979_s8 + $0x290] sm:$0xff] (%p3185_p10), %v2120_v30 }
 0x2f4   : > { %v1964_v18 = vadd.f32 %v1963_v37, %v3926_v40  ;;  %v1992_v1 = vadd.f32 %v1991_v36, %v3929_v34  ;;  %v1909_v39 = vpop.f32.mrf.mxu0  ;;  %v1937_v41 = vpop.f32.mrf.mxu1  ;;  %v2080_v40 = vld [vmem:[%s3253_s15 + $0x10] sm:$0xff] (%p3185_p10)  ;;  %v2082_v34 = vld [vmem:[%s3253_s15 + $0x18] sm:$0xff] (%p3185_p10) }
 0x2f5   : > { %2081 = vst [vmem:[%s3979_s8 + $0x10] sm:$0xff] (%p3185_p10), %v2080_v40 }
 0x2f6   : > { %v2022_v28 = vpack.c.bf16 %v1992_v1, %v1964_v18  ;;  %2083 = vst [vmem:[%s3979_s8 + $0x18] sm:$0xff] (%p3185_p10), %v2082_v34 }
 0x2f7   : > { %2057 = sbr.rel (!%p3185_p10) target bundleno = 769 (0x301), region = 68  ;;  %v2122_v29 = vld [vmem:[%s3253_s15 + $0xb8] sm:$0xff] (%p3185_p10) }
 0x2f8   : > { %2050 = vst [vmem:[%s3253_s15 + $0xd8] sm:$0x11] %v2022_v28  ;;  %v2128_v32 = vld [vmem:[%s3253_s15 + $0xd0] sm:$0xff] (%p3185_p10) }
 0x2f9   : > { %2123 = vst [vmem:[%s3979_s8 + $0x298] sm:$0xff] (%p3185_p10), %v2122_v29 }
 0x2fa   : > { %2129 = vst [vmem:[%s3979_s8 + $0x310] sm:$0xff] (%p3185_p10), %v2128_v32 }
 0x2fb   : > { %v1965_v3 = vpop.f32.mrf.mxu2  ;;  %v1993_v20 = vpop.f32.mrf.mxu3 }
 0x2ff   : > { %v2130_v42 = vld [vmem:[%s3253_s15 + $0xd8] sm:$0xff] }
 0x300   : > { %2131 = vst [vmem:[%s3979_s8 + $0x318] sm:$0xff] %v2130_v42 }
 0x301 PF: > { %s4082_s24 = sld [smem:[#allocation15_spill]]  ;;  %s4086_s21 = smov %s3050_s22 }
 0x302   : > { %s4083_s30 = sld [smem:[#allocation14_spill]] }
 0x303   : > { %s4084_s23 = sld [smem:[#allocation17_spill]] }
 0x304   : > { %s4085_s13 = sld [smem:[#allocation16_spill]] }
 0x307   : > { %s18_s26 = sadd.s32 1, %s4082_s24   ;;  %s4088_s24 = smov %s3062_s25 }
 0x308   : > { %p15_p4 = scmp.ge.s32.totalorder %s18_s26, 6   ;;  %s4087_s22 = smov %s4083_s30 }
 0x30a   : > { %s4089_s25 = smov %s4085_s13  ;;  %17 = sbr.rel (!%p15_p4) target bundleno = 8 (0x8), region = 133 }
 0x30f   :  { %2147 = vsyncpa [#allocation5], 1 }
 0x310   :  { %2149 = vsyncpa [#allocation5 + $0x1], 1 }
 0x311   :  { %2150 = vsyncpa [#allocation7], 1 }

</bundles_post_ra>
